<compile_context>
chip_gen: v5e
topology: v5e:2x2
jax: 0.10.0
libtpu: 0.0.40
codegen_flags: <defaults>
</compile_context>

<pallas_src>
import functools
import math

import jax
import jax.numpy as jnp
import numpy as np
from jax.experimental import pallas as pl
from jax.experimental.pallas import tpu as pltpu

LN_EPS = 1e-5          # torch.nn.LayerNorm default
NEG_INF = -1e9         # reference uses scores[mask == 1] = -1e9


# ----------------------------- fused Pallas kernel (one batch element per grid step) -----------------------------

def _decoder_layer_kernel(
    x_ref, xe_ref, smask_ref, cmask_ref,
    s_wq_ref, s_wk_ref, s_wv_ref, s_wo_ref, s_g_ref, s_b_ref,
    c_wq_ref, c_wk_ref, c_wv_ref, c_wo_ref, c_g_ref, c_b_ref,
    w1_ref, b1_ref, w2_ref, b2_ref, f_g_ref, f_b_ref,
    o_ref, *, inv_scale):
    """One whole decoder layer for one batch element.

    x_ref:  (Lq, D) decoder inputs        xe_ref: (Lk, D) encoder outputs
    smask_ref: (Lq, Lq) bf16 0/1 mask     cmask_ref: (Lq, Lk) bf16 0/1 mask (1 == masked)
    Projection / FFN weights arrive pre-cast to bf16; LN params & biases are f32.
    """
    f32 = jnp.float32
    bf16 = jnp.bfloat16

    def layer_norm(y, g, b):
        # two-pass variance (cancellation-safe), all in f32
        mean = jnp.mean(y, axis=-1, keepdims=True)
        d = y - mean
        var = jnp.mean(d * d, axis=-1, keepdims=True)
        return d * jax.lax.rsqrt(var + LN_EPS) * g + b

    def attention(x_q, x_kv, mask, wq, wk, wv, wo, g, b):
        xq_b = x_q.astype(bf16)
        xkv_b = x_kv.astype(bf16)
        q = jnp.dot(xq_b, wq, preferred_element_type=f32)     # (Lq, P)
        k = jnp.dot(xkv_b, wk, preferred_element_type=f32)    # (Lk, P)
        v = jnp.dot(xkv_b, wv, preferred_element_type=f32)    # (Lk, Pv)
        # q @ k^T expressed as a contraction (no materialized transpose of k)
        s = jax.lax.dot_general(
            q.astype(bf16), k.astype(bf16),
            dimension_numbers=(((1,), (1,)), ((), ())),
            preferred_element_type=f32) * inv_scale            # (Lq, Lk) f32
        s = jnp.where(mask >= 0.5, NEG_INF, s)                 # masked positions -> -1e9
        m = jnp.max(s, axis=-1, keepdims=True)
        p = jnp.exp(s - m)
        l = jnp.sum(p, axis=-1, keepdims=True)
        attn = p * pl.reciprocal(l)                            # exact recip + multiply
        ctx = jnp.dot(attn.astype(bf16), v.astype(bf16),
                      preferred_element_type=f32)              # (Lq, Pv)
        proj = jnp.dot(ctx.astype(bf16), wo,
                       preferred_element_type=f32)             # (Lq, D)
        return layer_norm(proj + x_q, g, b)

    x = x_ref[...]          # f32 (Lq, D)
    xe = xe_ref[...]        # f32 (Lk, D)

    # self-attention (+ residual + LN)
    a1 = attention(x, x, smask_ref[...],
                   s_wq_ref[...], s_wk_ref[...], s_wv_ref[...], s_wo_ref[...],
                   s_g_ref[...], s_b_ref[...])
    # cross-attention over encoder output (+ residual + LN)
    a2 = attention(a1, xe, cmask_ref[...],
                   c_wq_ref[...], c_wk_ref[...], c_wv_ref[...], c_wo_ref[...],
                   c_g_ref[...], c_b_ref[...])

    # feed-forward (+ residual + LN)
    h = jnp.dot(a2.astype(bf16), w1_ref[...], preferred_element_type=f32) + b1_ref[...]
    h = jnp.maximum(h, 0.0)
    c = jnp.dot(h.astype(bf16), w2_ref[...], preferred_element_type=f32) + b2_ref[...]
    y = layer_norm(a2 + c, f_g_ref[...], f_b_ref[...])

    o_ref[...] = y.astype(o_ref.dtype)


# ----------------------------- wrapper -----------------------------

def decoder_layer(inputs, encoder_output, self_mask, cross_mask, params, dimq):
    """inputs: (N, Lq, D); encoder_output: (N, Lk, D); masks: (N, Lq, L*) 0/1 float."""
    N, Lq, D = inputs.shape
    Lk = encoder_output.shape[1]
    sa, ca, ff = params["self_attn"], params["cross_attn"], params["ffn"]
    bf16 = jnp.bfloat16

    # bf16 for everything that feeds the MXU; f32 for LN params / biases (VPU math).
    w_ops = [sa["wq"].astype(bf16), sa["wk"].astype(bf16), sa["wv"].astype(bf16),
             sa["wo"].astype(bf16), sa["ln_g"], sa["ln_b"],
             ca["wq"].astype(bf16), ca["wk"].astype(bf16), ca["wv"].astype(bf16),
             ca["wo"].astype(bf16), ca["ln_g"], ca["ln_b"],
             ff["w1"].astype(bf16), ff["b1"], ff["w2"].astype(bf16), ff["b2"],
             ff["ln_g"], ff["ln_b"]]
    sm = self_mask.astype(bf16)       # half the mask DMA vs f32
    cm = cross_mask.astype(bf16)

    def batched(*shape):
        nd = len(shape)
        return pl.BlockSpec((None,) + shape, lambda i, _n=nd: (i,) + (0,) * _n)

    def replicated(arr):
        nd = arr.ndim
        return pl.BlockSpec(arr.shape, lambda i, _n=nd: (0,) * _n)

    in_specs = ([batched(Lq, D), batched(Lk, D), batched(Lq, Lq), batched(Lq, Lk)]
                + [replicated(w) for w in w_ops])
    out_specs = pl.BlockSpec((None, Lq, D), lambda i: (i, 0, 0))

    # rough advisory cost estimate for the XLA scheduler
    P, Pv, H = sa["wq"].shape[1], sa["wv"].shape[1], ff["w1"].shape[1]
    mm = lambda m, k, n: 2 * m * k * n
    flops = N * (mm(Lq, D, P) * 2 + mm(Lq, D, Pv) + mm(Lq, P, Lq) + mm(Lq, Lq, Pv) + mm(Lq, Pv, D)
                 + mm(Lq, D, P) + mm(Lk, D, P) + mm(Lk, D, Pv) + mm(Lq, P, Lk) + mm(Lq, Lk, Pv)
                 + mm(Lq, Pv, D) + mm(Lq, D, H) + mm(Lq, H, D))
    transcendentals = N * (Lq * Lq + Lq * Lk + 5 * Lq)
    bytes_accessed = int(sum(int(np.prod(a.shape)) * a.dtype.itemsize
                             for a in [inputs, encoder_output, sm, cm] + w_ops)
                         + N * Lq * D * inputs.dtype.itemsize)

    kernel = functools.partial(_decoder_layer_kernel, inv_scale=1.0 / math.sqrt(dimq))
    out = pl.pallas_call(
        kernel,
        out_shape=jax.ShapeDtypeStruct((N, Lq, D), inputs.dtype),
        grid_spec=pltpu.PrefetchScalarGridSpec(
            num_scalar_prefetch=0,
            grid=(N,),
            in_specs=in_specs,
            out_specs=out_specs),
        compiler_params=pltpu.CompilerParams(
            dimension_semantics=("parallel",)),        # batch axis -> both TCs on v7x
        cost_estimate=pl.CostEstimate(flops=flops, transcendentals=transcendentals,
                                      bytes_accessed=bytes_accessed),
    )(inputs, encoder_output, sm, cm, *w_ops)
    return out


# ----------------------------- references -----------------------------

def _ln_ref(y, g, b):
    mean = jnp.mean(y, axis=-1, keepdims=True)
    d = y - mean
    var = jnp.mean(d * d, axis=-1, keepdims=True)
    return d * jax.lax.rsqrt(var + LN_EPS) * g + b


# (a) pure-f32 reference: exact mirror of the PyTorch module's math
def _attn_f32(xq, xkv, mask, p, dimk):
    q = xq @ p["wq"]; k = xkv @ p["wk"]; v = xkv @ p["wv"]
    s = jnp.einsum("nqd,nkd->nqk", q, k) / math.sqrt(dimk)
    s = jnp.where(mask == 1.0, NEG_INF, s)
    w = jax.nn.softmax(s, axis=-1) @ v
    return _ln_ref(w @ p["wo"] + xq, p["ln_g"], p["ln_b"])


def _ffn_f32(x, p):
    h = jnp.maximum(x @ p["w1"] + p["b1"], 0.0)
    return _ln_ref(x + h @ p["w2"] + p["b2"], p["ln_g"], p["ln_b"])


def decoder_layer_ref_f32(inputs, enc, sm, cm, params, dimq):
    a1 = _attn_f32(inputs, inputs, sm, params["self_attn"], dimq)
    a2 = _attn_f32(a1, enc, cm, params["cross_attn"], dimq)
    return _ffn_f32(a2, params["ffn"])


# (b) numerics-matched reference: same math but with the kernel's bf16 matmul-operand rounding
#     (f32 accumulation) — used for the tight parity assert.
def _attn_matched(xq, xkv, mask, p, dimk):
    bf16, f32 = jnp.bfloat16, jnp.float32
    q = jnp.einsum("nld,dp->nlp", xq.astype(bf16), p["wq"].astype(bf16), preferred_element_type=f32)
    k = jnp.einsum("nld,dp->nlp", xkv.astype(bf16), p["wk"].astype(bf16), preferred_element_type=f32)
    v = jnp.einsum("nld,dp->nlp", xkv.astype(bf16), p["wv"].astype(bf16), preferred_element_type=f32)
    s = jnp.einsum("nqp,nkp->nqk", q.astype(bf16), k.astype(bf16),
                   preferred_element_type=f32) / math.sqrt(dimk)
    s = jnp.where(mask >= 0.5, NEG_INF, s)
    m = jnp.max(s, -1, keepdims=True)
    e = jnp.exp(s - m)
    probs = e / jnp.sum(e, -1, keepdims=True)
    ctx = jnp.einsum("nqk,nkp->nqp", probs.astype(bf16), v.astype(bf16), preferred_element_type=f32)
    proj = jnp.einsum("nqp,pd->nqd", ctx.astype(bf16), p["wo"].astype(bf16), preferred_element_type=f32)
    return _ln_ref(proj + xq, p["ln_g"], p["ln_b"])


def _ffn_matched(x, p):
    bf16, f32 = jnp.bfloat16, jnp.float32
    h = jnp.einsum("nld,dh->nlh", x.astype(bf16), p["w1"].astype(bf16), preferred_element_type=f32) + p["b1"]
    h = jnp.maximum(h, 0.0)
    c = jnp.einsum("nlh,hd->nld", h.astype(bf16), p["w2"].astype(bf16), preferred_element_type=f32) + p["b2"]
    return _ln_ref(x + c, p["ln_g"], p["ln_b"])


def decoder_layer_ref_matched(inputs, enc, sm, cm, params, dimq):
    a1 = _attn_matched(inputs, inputs, sm, params["self_attn"], dimq)
    a2 = _attn_matched(a1, enc, cm, params["cross_attn"], dimq)
    return _ffn_matched(a2, params["ffn"])


# ----------------------------- param init -----------------------------

def make_params(key, d_model, dimq, dimv, n_heads, d_hidden):
    keys = jax.random.split(key, 16)
    P, Pv = dimq * n_heads, dimv * n_heads

    def attn_params(ks):
        return dict(
            wq=jax.random.normal(ks[0], (d_model, P), jnp.float32) / math.sqrt(d_model),
            wk=jax.random.normal(ks[1], (d_model, P), jnp.float32) / math.sqrt(d_model),
            wv=jax.random.normal(ks[2], (d_model, Pv), jnp.float32) / math.sqrt(d_model),
            wo=jax.random.normal(ks[3], (Pv, d_model), jnp.float32) / math.sqrt(Pv),
            ln_g=jnp.ones((1, d_model), jnp.float32),
            ln_b=jnp.zeros((1, d_model), jnp.float32),
        )

    ffn = dict(
        w1=jax.random.normal(keys[8], (d_model, d_hidden), jnp.float32) / math.sqrt(d_model),
        b1=jax.random.normal(keys[9], (1, d_hidden), jnp.float32) * 0.01,
        w2=jax.random.normal(keys[10], (d_hidden, d_model), jnp.float32) / math.sqrt(d_hidden),
        b2=jax.random.normal(keys[11], (1, d_model), jnp.float32) * 0.01,
        ln_g=jnp.ones((1, d_model), jnp.float32),
        ln_b=jnp.zeros((1, d_model), jnp.float32),
    )
    return dict(self_attn=attn_params(keys[0:4]),
                cross_attn=attn_params(keys[4:8]),
                ffn=ffn)


# ----------------------------- main -----------------------------

if __name__ == "__main__":
    # conf: d_model=32, dimq=8, dimv=8, n_heads=4, d_hidden=64
    N, TGT, SRC, D_MODEL, DIMQ, DIMV, N_HEADS, D_HIDDEN = 2, 8, 8, 32, 8, 8, 4, 64

    key = jax.random.PRNGKey(0)
    k_in, k_enc, k_par = jax.random.split(key, 3)

    inputs = jax.random.normal(k_in, (N, TGT, D_MODEL), jnp.float32)
    encoder_output = jax.random.normal(k_enc, (N, SRC, D_MODEL), jnp.float32)

    # causal self-mask: 1 where key position > query position (masked)
    self_mask = jnp.broadcast_to(
        (jnp.arange(TGT)[None, :] > jnp.arange(TGT)[:, None]).astype(jnp.float32),
        (N, TGT, TGT))
    # cross mask: mask out the last two source positions for batch 0 only
    cm0 = jnp.zeros((TGT, SRC), jnp.float32).at[:, SRC - 2:].set(1.0)
    cross_mask = jnp.stack([cm0, jnp.zeros((TGT, SRC), jnp.float32)], axis=0)

    params = make_params(k_par, D_MODEL, DIMQ, DIMV, N_HEADS, D_HIDDEN)

    layer = jax.jit(functools.partial(decoder_layer, params=params, dimq=DIMQ))
    out = jax.block_until_ready(layer(inputs, encoder_output, self_mask, cross_mask))

    # Tight parity against a numerics-matched (bf16-operand, f32-accumulate) XLA reference.
    ref_m = decoder_layer_ref_matched(inputs, encoder_output, self_mask, cross_mask, params, DIMQ)
    np.testing.assert_allclose(np.asarray(out), np.asarray(ref_m), rtol=1e-2, atol=1e-2)

    # Loose sanity bound against the pure-f32 PyTorch-equivalent math (bf16 MXU operands
    # introduce ~1e-2-level deviation; typical max-abs diff here is a few 1e-2).
    ref_f32 = decoder_layer_ref_f32(inputs, encoder_output, self_mask, cross_mask, params, DIMQ)
    np.testing.assert_allclose(np.asarray(out), np.asarray(ref_f32), rtol=0.5, atol=0.5)

    print("KERNEL_OK")
</pallas_src>

<mosaic_0001>
module attributes {stable_mosaic.version = 11 : i64} {
  func.func @_decoder_layer_kernel(%arg0: i32, %arg1: memref<1x8x32xf32, #tpu.memory_space<vmem>>, %arg2: memref<1x8x32xf32, #tpu.memory_space<vmem>>, %arg3: memref<1x8x8xbf16, #tpu.memory_space<vmem>>, %arg4: memref<1x8x8xbf16, #tpu.memory_space<vmem>>, %arg5: memref<32x32xbf16, #tpu.memory_space<vmem>>, %arg6: memref<32x32xbf16, #tpu.memory_space<vmem>>, %arg7: memref<32x32xbf16, #tpu.memory_space<vmem>>, %arg8: memref<32x32xbf16, #tpu.memory_space<vmem>>, %arg9: memref<1x32xf32, #tpu.memory_space<vmem>>, %arg10: memref<1x32xf32, #tpu.memory_space<vmem>>, %arg11: memref<32x32xbf16, #tpu.memory_space<vmem>>, %arg12: memref<32x32xbf16, #tpu.memory_space<vmem>>, %arg13: memref<32x32xbf16, #tpu.memory_space<vmem>>, %arg14: memref<32x32xbf16, #tpu.memory_space<vmem>>, %arg15: memref<1x32xf32, #tpu.memory_space<vmem>>, %arg16: memref<1x32xf32, #tpu.memory_space<vmem>>, %arg17: memref<32x64xbf16, #tpu.memory_space<vmem>>, %arg18: memref<1x64xf32, #tpu.memory_space<vmem>>, %arg19: memref<64x32xbf16, #tpu.memory_space<vmem>>, %arg20: memref<1x32xf32, #tpu.memory_space<vmem>>, %arg21: memref<1x32xf32, #tpu.memory_space<vmem>>, %arg22: memref<1x32xf32, #tpu.memory_space<vmem>>, %arg23: memref<1x8x32xf32, #tpu.memory_space<vmem>>) attributes {dimension_semantics = [#tpu.dimension_semantics<parallel>], iteration_bounds = array<i64: 2>, scalar_prefetch = 0 : i64, scratch_operands = 0 : i64, tpu.core_type = #tpu.core_type<tc>, window_params = [{transform_indices = @transform_0, window_bounds = array<i64: 1, 8, 32>}, {transform_indices = @transform_1, window_bounds = array<i64: 1, 8, 32>}, {transform_indices = @transform_2, window_bounds = array<i64: 1, 8, 8>}, {transform_indices = @transform_3, window_bounds = array<i64: 1, 8, 8>}, {pipeline_mode = #tpu.pipeline_mode<synchronous>, transform_indices = @transform_4, window_bounds = array<i64: 32, 32>}, {pipeline_mode = #tpu.pipeline_mode<synchronous>, transform_indices = @transform_5, window_bounds = array<i64: 32, 32>}, {pipeline_mode = #tpu.pipeline_mode<synchronous>, transform_indices = @transform_6, window_bounds = array<i64: 32, 32>}, {pipeline_mode = #tpu.pipeline_mode<synchronous>, transform_indices = @transform_7, window_bounds = array<i64: 32, 32>}, {pipeline_mode = #tpu.pipeline_mode<synchronous>, transform_indices = @transform_8, window_bounds = array<i64: 1, 32>}, {pipeline_mode = #tpu.pipeline_mode<synchronous>, transform_indices = @transform_9, window_bounds = array<i64: 1, 32>}, {pipeline_mode = #tpu.pipeline_mode<synchronous>, transform_indices = @transform_10, window_bounds = array<i64: 32, 32>}, {pipeline_mode = #tpu.pipeline_mode<synchronous>, transform_indices = @transform_11, window_bounds = array<i64: 32, 32>}, {pipeline_mode = #tpu.pipeline_mode<synchronous>, transform_indices = @transform_12, window_bounds = array<i64: 32, 32>}, {pipeline_mode = #tpu.pipeline_mode<synchronous>, transform_indices = @transform_13, window_bounds = array<i64: 32, 32>}, {pipeline_mode = #tpu.pipeline_mode<synchronous>, transform_indices = @transform_14, window_bounds = array<i64: 1, 32>}, {pipeline_mode = #tpu.pipeline_mode<synchronous>, transform_indices = @transform_15, window_bounds = array<i64: 1, 32>}, {pipeline_mode = #tpu.pipeline_mode<synchronous>, transform_indices = @transform_16, window_bounds = array<i64: 32, 64>}, {pipeline_mode = #tpu.pipeline_mode<synchronous>, transform_indices = @transform_17, window_bounds = array<i64: 1, 64>}, {pipeline_mode = #tpu.pipeline_mode<synchronous>, transform_indices = @transform_18, window_bounds = array<i64: 64, 32>}, {pipeline_mode = #tpu.pipeline_mode<synchronous>, transform_indices = @transform_19, window_bounds = array<i64: 1, 32>}, {pipeline_mode = #tpu.pipeline_mode<synchronous>, transform_indices = @transform_20, window_bounds = array<i64: 1, 32>}, {pipeline_mode = #tpu.pipeline_mode<synchronous>, transform_indices = @transform_21, window_bounds = array<i64: 1, 32>}, {transform_indices = @transform_22, window_bounds = array<i64: 1, 8, 32>}]} {
    %c0 = arith.constant 0 : index
    %c0_0 = arith.constant 0 : index
    %c0_1 = arith.constant 0 : index
    %0 = vector.load %arg1[%c0, %c0_0, %c0_1] : memref<1x8x32xf32, #tpu.memory_space<vmem>>, vector<1x8x32xf32>
    %1 = vector.shape_cast %0 : vector<1x8x32xf32> to vector<8x32xf32>
    %c0_2 = arith.constant 0 : index
    %c0_3 = arith.constant 0 : index
    %c0_4 = arith.constant 0 : index
    %2 = vector.load %arg2[%c0_2, %c0_3, %c0_4] : memref<1x8x32xf32, #tpu.memory_space<vmem>>, vector<1x8x32xf32>
    %3 = vector.shape_cast %2 : vector<1x8x32xf32> to vector<8x32xf32>
    %c0_5 = arith.constant 0 : index
    %c0_6 = arith.constant 0 : index
    %c0_7 = arith.constant 0 : index
    %4 = vector.load %arg3[%c0_5, %c0_6, %c0_7] : memref<1x8x8xbf16, #tpu.memory_space<vmem>>, vector<1x8x8xbf16>
    %5 = vector.shape_cast %4 : vector<1x8x8xbf16> to vector<8x8xbf16>
    %c0_8 = arith.constant 0 : index
    %c0_9 = arith.constant 0 : index
    %6 = vector.load %arg5[%c0_8, %c0_9] : memref<32x32xbf16, #tpu.memory_space<vmem>>, vector<32x32xbf16>
    %c0_10 = arith.constant 0 : index
    %c0_11 = arith.constant 0 : index
    %7 = vector.load %arg6[%c0_10, %c0_11] : memref<32x32xbf16, #tpu.memory_space<vmem>>, vector<32x32xbf16>
    %c0_12 = arith.constant 0 : index
    %c0_13 = arith.constant 0 : index
    %8 = vector.load %arg7[%c0_12, %c0_13] : memref<32x32xbf16, #tpu.memory_space<vmem>>, vector<32x32xbf16>
    %c0_14 = arith.constant 0 : index
    %c0_15 = arith.constant 0 : index
    %9 = vector.load %arg8[%c0_14, %c0_15] : memref<32x32xbf16, #tpu.memory_space<vmem>>, vector<32x32xbf16>
    %c0_16 = arith.constant 0 : index
    %c0_17 = arith.constant 0 : index
    %10 = vector.load %arg9[%c0_16, %c0_17] : memref<1x32xf32, #tpu.memory_space<vmem>>, vector<1x32xf32>
    %c0_18 = arith.constant 0 : index
    %c0_19 = arith.constant 0 : index
    %11 = vector.load %arg10[%c0_18, %c0_19] : memref<1x32xf32, #tpu.memory_space<vmem>>, vector<1x32xf32>
    %12 = arith.truncf %1 : vector<8x32xf32> to vector<8x32xbf16>
    %13 = arith.truncf %1 : vector<8x32xf32> to vector<8x32xbf16>
    %cst = arith.constant dense<0.000000e+00> : vector<8x32xf32>
    %14 = tpu.matmul %12, %6, %cst {dimension_numbers = #tpu.dot_dimension_numbers<[1], [0], [0], [1], [0, 0, 1, 1], [], []>} : vector<8x32xbf16>, vector<32x32xbf16>, vector<8x32xf32> -> vector<8x32xf32>
    %cst_20 = arith.constant dense<0.000000e+00> : vector<8x32xf32>
    %15 = tpu.matmul %13, %7, %cst_20 {dimension_numbers = #tpu.dot_dimension_numbers<[1], [0], [0], [1], [0, 0, 1, 1], [], []>} : vector<8x32xbf16>, vector<32x32xbf16>, vector<8x32xf32> -> vector<8x32xf32>
    %cst_21 = arith.constant dense<0.000000e+00> : vector<8x32xf32>
    %16 = tpu.matmul %13, %8, %cst_21 {dimension_numbers = #tpu.dot_dimension_numbers<[1], [0], [0], [1], [0, 0, 1, 1], [], []>} : vector<8x32xbf16>, vector<32x32xbf16>, vector<8x32xf32> -> vector<8x32xf32>
    %17 = arith.truncf %14 : vector<8x32xf32> to vector<8x32xbf16>
    %18 = arith.truncf %15 : vector<8x32xf32> to vector<8x32xbf16>
    %cst_22 = arith.constant dense<0.000000e+00> : vector<8x8xf32>
    %19 = tpu.matmul %17, %18, %cst_22 {dimension_numbers = #tpu.dot_dimension_numbers<[1], [1], [0], [0], [0, 0, 1, 0], [], []>} : vector<8x32xbf16>, vector<8x32xbf16>, vector<8x8xf32> -> vector<8x8xf32>
    %cst_23 = arith.constant 0.353553385 : f32
    %20 = vector.broadcast %cst_23 : f32 to vector<8x8xf32>
    %21 = arith.mulf %19, %20 : vector<8x8xf32>
    %cst_24 = arith.constant 5.000000e-01 : bf16
    %22 = vector.broadcast %cst_24 : bf16 to vector<8x8xbf16>
    %23 = arith.cmpf oge, %5, %22 : vector<8x8xbf16>
    %cst_25 = arith.constant -1.000000e+09 : f32
    %24 = vector.broadcast %cst_25 : f32 to vector<8x8xf32>
    %25 = arith.select %23, %24, %21 : vector<8x8xi1>, vector<8x8xf32>
    %cst_26 = arith.constant dense<0xFF800000> : vector<8xf32>
    %26 = vector.multi_reduction <maximumf>, %25, %cst_26 [1] : vector<8x8xf32> to vector<8xf32>
    %27 = vector.shape_cast %26 : vector<8xf32> to vector<8x1xf32>
    %28 = vector.broadcast %27 : vector<8x1xf32> to vector<8x8xf32>
    %29 = arith.subf %25, %28 : vector<8x8xf32>
    %30 = math.exp %29 : vector<8x8xf32>
    %cst_27 = arith.constant dense<0.000000e+00> : vector<8xf32>
    %31 = vector.multi_reduction <add>, %30, %cst_27 [1] : vector<8x8xf32> to vector<8xf32>
    %32 = vector.shape_cast %31 : vector<8xf32> to vector<8x1xf32>
    %33 = tpu.reciprocal %32 : vector<8x1xf32> -> vector<8x1xf32>
    %34 = vector.broadcast %33 : vector<8x1xf32> to vector<8x8xf32>
    %35 = arith.mulf %30, %34 : vector<8x8xf32>
    %36 = arith.truncf %35 : vector<8x8xf32> to vector<8x8xbf16>
    %37 = arith.truncf %16 : vector<8x32xf32> to vector<8x32xbf16>
    %cst_28 = arith.constant dense<0.000000e+00> : vector<8x32xf32>
    %38 = tpu.matmul %36, %37, %cst_28 {dimension_numbers = #tpu.dot_dimension_numbers<[1], [0], [0], [1], [0, 0, 1, 1], [], []>} : vector<8x8xbf16>, vector<8x32xbf16>, vector<8x32xf32> -> vector<8x32xf32>
    %39 = arith.truncf %38 : vector<8x32xf32> to vector<8x32xbf16>
    %cst_29 = arith.constant dense<0.000000e+00> : vector<8x32xf32>
    %40 = tpu.matmul %39, %9, %cst_29 {dimension_numbers = #tpu.dot_dimension_numbers<[1], [0], [0], [1], [0, 0, 1, 1], [], []>} : vector<8x32xbf16>, vector<32x32xbf16>, vector<8x32xf32> -> vector<8x32xf32>
    %41 = arith.addf %40, %1 : vector<8x32xf32>
    %cst_30 = arith.constant dense<0.000000e+00> : vector<8xf32>
    %42 = vector.multi_reduction <add>, %41, %cst_30 [1] : vector<8x32xf32> to vector<8xf32>
    %43 = vector.shape_cast %42 : vector<8xf32> to vector<8x1xf32>
    %cst_31 = arith.constant 3.200000e+01 : f32
    %44 = vector.broadcast %cst_31 : f32 to vector<8x1xf32>
    %45 = arith.divf %43, %44 : vector<8x1xf32>
    %46 = vector.broadcast %45 : vector<8x1xf32> to vector<8x32xf32>
    %47 = arith.subf %41, %46 : vector<8x32xf32>
    %48 = arith.mulf %47, %47 : vector<8x32xf32>
    %cst_32 = arith.constant dense<0.000000e+00> : vector<8xf32>
    %49 = vector.multi_reduction <add>, %48, %cst_32 [1] : vector<8x32xf32> to vector<8xf32>
    %50 = vector.shape_cast %49 : vector<8xf32> to vector<8x1xf32>
    %cst_33 = arith.constant 3.200000e+01 : f32
    %51 = vector.broadcast %cst_33 : f32 to vector<8x1xf32>
    %52 = arith.divf %50, %51 : vector<8x1xf32>
    %cst_34 = arith.constant 9.99999974E-6 : f32
    %53 = vector.broadcast %cst_34 : f32 to vector<8x1xf32>
    %54 = arith.addf %52, %53 : vector<8x1xf32>
    %55 = math.rsqrt %54 : vector<8x1xf32>
    %56 = vector.broadcast %55 : vector<8x1xf32> to vector<8x32xf32>
    %57 = arith.mulf %47, %56 : vector<8x32xf32>
    %58 = vector.broadcast %10 : vector<1x32xf32> to vector<8x32xf32>
    %59 = arith.mulf %57, %58 : vector<8x32xf32>
    %60 = vector.broadcast %11 : vector<1x32xf32> to vector<8x32xf32>
    %61 = arith.addf %59, %60 : vector<8x32xf32>
    %c0_35 = arith.constant 0 : index
    %c0_36 = arith.constant 0 : index
    %c0_37 = arith.constant 0 : index
    %62 = vector.load %arg4[%c0_35, %c0_36, %c0_37] : memref<1x8x8xbf16, #tpu.memory_space<vmem>>, vector<1x8x8xbf16>
    %63 = vector.shape_cast %62 : vector<1x8x8xbf16> to vector<8x8xbf16>
    %c0_38 = arith.constant 0 : index
    %c0_39 = arith.constant 0 : index
    %64 = vector.load %arg11[%c0_38, %c0_39] : memref<32x32xbf16, #tpu.memory_space<vmem>>, vector<32x32xbf16>
    %c0_40 = arith.constant 0 : index
    %c0_41 = arith.constant 0 : index
    %65 = vector.load %arg12[%c0_40, %c0_41] : memref<32x32xbf16, #tpu.memory_space<vmem>>, vector<32x32xbf16>
    %c0_42 = arith.constant 0 : index
    %c0_43 = arith.constant 0 : index
    %66 = vector.load %arg13[%c0_42, %c0_43] : memref<32x32xbf16, #tpu.memory_space<vmem>>, vector<32x32xbf16>
    %c0_44 = arith.constant 0 : index
    %c0_45 = arith.constant 0 : index
    %67 = vector.load %arg14[%c0_44, %c0_45] : memref<32x32xbf16, #tpu.memory_space<vmem>>, vector<32x32xbf16>
    %c0_46 = arith.constant 0 : index
    %c0_47 = arith.constant 0 : index
    %68 = vector.load %arg15[%c0_46, %c0_47] : memref<1x32xf32, #tpu.memory_space<vmem>>, vector<1x32xf32>
    %c0_48 = arith.constant 0 : index
    %c0_49 = arith.constant 0 : index
    %69 = vector.load %arg16[%c0_48, %c0_49] : memref<1x32xf32, #tpu.memory_space<vmem>>, vector<1x32xf32>
    %70 = arith.truncf %61 : vector<8x32xf32> to vector<8x32xbf16>
    %71 = arith.truncf %3 : vector<8x32xf32> to vector<8x32xbf16>
    %cst_50 = arith.constant dense<0.000000e+00> : vector<8x32xf32>
    %72 = tpu.matmul %70, %64, %cst_50 {dimension_numbers = #tpu.dot_dimension_numbers<[1], [0], [0], [1], [0, 0, 1, 1], [], []>} : vector<8x32xbf16>, vector<32x32xbf16>, vector<8x32xf32> -> vector<8x32xf32>
    %cst_51 = arith.constant dense<0.000000e+00> : vector<8x32xf32>
    %73 = tpu.matmul %71, %65, %cst_51 {dimension_numbers = #tpu.dot_dimension_numbers<[1], [0], [0], [1], [0, 0, 1, 1], [], []>} : vector<8x32xbf16>, vector<32x32xbf16>, vector<8x32xf32> -> vector<8x32xf32>
    %cst_52 = arith.constant dense<0.000000e+00> : vector<8x32xf32>
    %74 = tpu.matmul %71, %66, %cst_52 {dimension_numbers = #tpu.dot_dimension_numbers<[1], [0], [0], [1], [0, 0, 1, 1], [], []>} : vector<8x32xbf16>, vector<32x32xbf16>, vector<8x32xf32> -> vector<8x32xf32>
    %75 = arith.truncf %72 : vector<8x32xf32> to vector<8x32xbf16>
    %76 = arith.truncf %73 : vector<8x32xf32> to vector<8x32xbf16>
    %cst_53 = arith.constant dense<0.000000e+00> : vector<8x8xf32>
    %77 = tpu.matmul %75, %76, %cst_53 {dimension_numbers = #tpu.dot_dimension_numbers<[1], [1], [0], [0], [0, 0, 1, 0], [], []>} : vector<8x32xbf16>, vector<8x32xbf16>, vector<8x8xf32> -> vector<8x8xf32>
    %cst_54 = arith.constant 0.353553385 : f32
    %78 = vector.broadcast %cst_54 : f32 to vector<8x8xf32>
    %79 = arith.mulf %77, %78 : vector<8x8xf32>
    %cst_55 = arith.constant 5.000000e-01 : bf16
    %80 = vector.broadcast %cst_55 : bf16 to vector<8x8xbf16>
    %81 = arith.cmpf oge, %63, %80 : vector<8x8xbf16>
    %cst_56 = arith.constant -1.000000e+09 : f32
    %82 = vector.broadcast %cst_56 : f32 to vector<8x8xf32>
    %83 = arith.select %81, %82, %79 : vector<8x8xi1>, vector<8x8xf32>
    %cst_57 = arith.constant dense<0xFF800000> : vector<8xf32>
    %84 = vector.multi_reduction <maximumf>, %83, %cst_57 [1] : vector<8x8xf32> to vector<8xf32>
    %85 = vector.shape_cast %84 : vector<8xf32> to vector<8x1xf32>
    %86 = vector.broadcast %85 : vector<8x1xf32> to vector<8x8xf32>
    %87 = arith.subf %83, %86 : vector<8x8xf32>
    %88 = math.exp %87 : vector<8x8xf32>
    %cst_58 = arith.constant dense<0.000000e+00> : vector<8xf32>
    %89 = vector.multi_reduction <add>, %88, %cst_58 [1] : vector<8x8xf32> to vector<8xf32>
    %90 = vector.shape_cast %89 : vector<8xf32> to vector<8x1xf32>
    %91 = tpu.reciprocal %90 : vector<8x1xf32> -> vector<8x1xf32>
    %92 = vector.broadcast %91 : vector<8x1xf32> to vector<8x8xf32>
    %93 = arith.mulf %88, %92 : vector<8x8xf32>
    %94 = arith.truncf %93 : vector<8x8xf32> to vector<8x8xbf16>
    %95 = arith.truncf %74 : vector<8x32xf32> to vector<8x32xbf16>
    %cst_59 = arith.constant dense<0.000000e+00> : vector<8x32xf32>
    %96 = tpu.matmul %94, %95, %cst_59 {dimension_numbers = #tpu.dot_dimension_numbers<[1], [0], [0], [1], [0, 0, 1, 1], [], []>} : vector<8x8xbf16>, vector<8x32xbf16>, vector<8x32xf32> -> vector<8x32xf32>
    %97 = arith.truncf %96 : vector<8x32xf32> to vector<8x32xbf16>
    %cst_60 = arith.constant dense<0.000000e+00> : vector<8x32xf32>
    %98 = tpu.matmul %97, %67, %cst_60 {dimension_numbers = #tpu.dot_dimension_numbers<[1], [0], [0], [1], [0, 0, 1, 1], [], []>} : vector<8x32xbf16>, vector<32x32xbf16>, vector<8x32xf32> -> vector<8x32xf32>
    %99 = arith.addf %98, %61 : vector<8x32xf32>
    %cst_61 = arith.constant dense<0.000000e+00> : vector<8xf32>
    %100 = vector.multi_reduction <add>, %99, %cst_61 [1] : vector<8x32xf32> to vector<8xf32>
    %101 = vector.shape_cast %100 : vector<8xf32> to vector<8x1xf32>
    %cst_62 = arith.constant 3.200000e+01 : f32
    %102 = vector.broadcast %cst_62 : f32 to vector<8x1xf32>
    %103 = arith.divf %101, %102 : vector<8x1xf32>
    %104 = vector.broadcast %103 : vector<8x1xf32> to vector<8x32xf32>
    %105 = arith.subf %99, %104 : vector<8x32xf32>
    %106 = arith.mulf %105, %105 : vector<8x32xf32>
    %cst_63 = arith.constant dense<0.000000e+00> : vector<8xf32>
    %107 = vector.multi_reduction <add>, %106, %cst_63 [1] : vector<8x32xf32> to vector<8xf32>
    %108 = vector.shape_cast %107 : vector<8xf32> to vector<8x1xf32>
    %cst_64 = arith.constant 3.200000e+01 : f32
    %109 = vector.broadcast %cst_64 : f32 to vector<8x1xf32>
    %110 = arith.divf %108, %109 : vector<8x1xf32>
    %cst_65 = arith.constant 9.99999974E-6 : f32
    %111 = vector.broadcast %cst_65 : f32 to vector<8x1xf32>
    %112 = arith.addf %110, %111 : vector<8x1xf32>
    %113 = math.rsqrt %112 : vector<8x1xf32>
    %114 = vector.broadcast %113 : vector<8x1xf32> to vector<8x32xf32>
    %115 = arith.mulf %105, %114 : vector<8x32xf32>
    %116 = vector.broadcast %68 : vector<1x32xf32> to vector<8x32xf32>
    %117 = arith.mulf %115, %116 : vector<8x32xf32>
    %118 = vector.broadcast %69 : vector<1x32xf32> to vector<8x32xf32>
    %119 = arith.addf %117, %118 : vector<8x32xf32>
    %120 = arith.truncf %119 : vector<8x32xf32> to vector<8x32xbf16>
    %c0_66 = arith.constant 0 : index
    %c0_67 = arith.constant 0 : index
    %121 = vector.load %arg17[%c0_66, %c0_67] : memref<32x64xbf16, #tpu.memory_space<vmem>>, vector<32x64xbf16>
    %cst_68 = arith.constant dense<0.000000e+00> : vector<8x64xf32>
    %122 = tpu.matmul %120, %121, %cst_68 {dimension_numbers = #tpu.dot_dimension_numbers<[1], [0], [0], [1], [0, 0, 1, 1], [], []>} : vector<8x32xbf16>, vector<32x64xbf16>, vector<8x64xf32> -> vector<8x64xf32>
    %c0_69 = arith.constant 0 : index
    %c0_70 = arith.constant 0 : index
    %123 = vector.load %arg18[%c0_69, %c0_70] : memref<1x64xf32, #tpu.memory_space<vmem>>, vector<1x64xf32>
    %124 = vector.broadcast %123 : vector<1x64xf32> to vector<8x64xf32>
    %125 = arith.addf %122, %124 : vector<8x64xf32>
    %cst_71 = arith.constant 0.000000e+00 : f32
    %126 = vector.broadcast %cst_71 : f32 to vector<8x64xf32>
    %127 = arith.maximumf %125, %126 : vector<8x64xf32>
    %128 = arith.truncf %127 : vector<8x64xf32> to vector<8x64xbf16>
    %c0_72 = arith.constant 0 : index
    %c0_73 = arith.constant 0 : index
    %129 = vector.load %arg19[%c0_72, %c0_73] : memref<64x32xbf16, #tpu.memory_space<vmem>>, vector<64x32xbf16>
    %cst_74 = arith.constant dense<0.000000e+00> : vector<8x32xf32>
    %130 = tpu.matmul %128, %129, %cst_74 {dimension_numbers = #tpu.dot_dimension_numbers<[1], [0], [0], [1], [0, 0, 1, 1], [], []>} : vector<8x64xbf16>, vector<64x32xbf16>, vector<8x32xf32> -> vector<8x32xf32>
    %c0_75 = arith.constant 0 : index
    %c0_76 = arith.constant 0 : index
    %131 = vector.load %arg20[%c0_75, %c0_76] : memref<1x32xf32, #tpu.memory_space<vmem>>, vector<1x32xf32>
    %132 = vector.broadcast %131 : vector<1x32xf32> to vector<8x32xf32>
    %133 = arith.addf %130, %132 : vector<8x32xf32>
    %134 = arith.addf %119, %133 : vector<8x32xf32>
    %c0_77 = arith.constant 0 : index
    %c0_78 = arith.constant 0 : index
    %135 = vector.load %arg21[%c0_77, %c0_78] : memref<1x32xf32, #tpu.memory_space<vmem>>, vector<1x32xf32>
    %c0_79 = arith.constant 0 : index
    %c0_80 = arith.constant 0 : index
    %136 = vector.load %arg22[%c0_79, %c0_80] : memref<1x32xf32, #tpu.memory_space<vmem>>, vector<1x32xf32>
    %cst_81 = arith.constant dense<0.000000e+00> : vector<8xf32>
    %137 = vector.multi_reduction <add>, %134, %cst_81 [1] : vector<8x32xf32> to vector<8xf32>
    %138 = vector.shape_cast %137 : vector<8xf32> to vector<8x1xf32>
    %cst_82 = arith.constant 3.200000e+01 : f32
    %139 = vector.broadcast %cst_82 : f32 to vector<8x1xf32>
    %140 = arith.divf %138, %139 : vector<8x1xf32>
    %141 = vector.broadcast %140 : vector<8x1xf32> to vector<8x32xf32>
    %142 = arith.subf %134, %141 : vector<8x32xf32>
    %143 = arith.mulf %142, %142 : vector<8x32xf32>
    %cst_83 = arith.constant dense<0.000000e+00> : vector<8xf32>
    %144 = vector.multi_reduction <add>, %143, %cst_83 [1] : vector<8x32xf32> to vector<8xf32>
    %145 = vector.shape_cast %144 : vector<8xf32> to vector<8x1xf32>
    %cst_84 = arith.constant 3.200000e+01 : f32
    %146 = vector.broadcast %cst_84 : f32 to vector<8x1xf32>
    %147 = arith.divf %145, %146 : vector<8x1xf32>
    %cst_85 = arith.constant 9.99999974E-6 : f32
    %148 = vector.broadcast %cst_85 : f32 to vector<8x1xf32>
    %149 = arith.addf %147, %148 : vector<8x1xf32>
    %150 = math.rsqrt %149 : vector<8x1xf32>
    %151 = vector.broadcast %150 : vector<8x1xf32> to vector<8x32xf32>
    %152 = arith.mulf %142, %151 : vector<8x32xf32>
    %153 = vector.broadcast %135 : vector<1x32xf32> to vector<8x32xf32>
    %154 = arith.mulf %152, %153 : vector<8x32xf32>
    %155 = vector.broadcast %136 : vector<1x32xf32> to vector<8x32xf32>
    %156 = arith.addf %154, %155 : vector<8x32xf32>
    %c0_86 = arith.constant 0 : index
    %c0_87 = arith.constant 0 : index
    %c0_88 = arith.constant 0 : index
    %157 = vector.load %arg23[%c0_86, %c0_87, %c0_88] : memref<1x8x32xf32, #tpu.memory_space<vmem>>, vector<1x8x32xf32>
    %158 = vector.shape_cast %157 : vector<1x8x32xf32> to vector<8x32xf32>
    %159 = vector.shape_cast %156 : vector<8x32xf32> to vector<1x8x32xf32>
    tpu.vector_store %arg23[%c0_86, %c0_87, %c0_88], %159 {strides = array<i32>} : memref<1x8x32xf32, #tpu.memory_space<vmem>>, vector<1x8x32xf32>,
    return
  }
  func.func @transform_0(%arg0: i32) -> (i32, i32, i32) {
    %c0_i32 = arith.constant 0 : i32
    %c0_i32_0 = arith.constant 0 : i32
    %c0_i32_1 = arith.constant 0 : i32
    return %arg0, %c0_i32, %c0_i32_0 : i32, i32, i32
  }
  func.func @transform_1(%arg0: i32) -> (i32, i32, i32) {
    %c0_i32 = arith.constant 0 : i32
    %c0_i32_0 = arith.constant 0 : i32
    %c0_i32_1 = arith.constant 0 : i32
    return %arg0, %c0_i32, %c0_i32_0 : i32, i32, i32
  }
  func.func @transform_2(%arg0: i32) -> (i32, i32, i32) {
    %c0_i32 = arith.constant 0 : i32
    %c0_i32_0 = arith.constant 0 : i32
    %c0_i32_1 = arith.constant 0 : i32
    return %arg0, %c0_i32, %c0_i32_0 : i32, i32, i32
  }
  func.func @transform_3(%arg0: i32) -> (i32, i32, i32) {
    %c0_i32 = arith.constant 0 : i32
    %c0_i32_0 = arith.constant 0 : i32
    %c0_i32_1 = arith.constant 0 : i32
    return %arg0, %c0_i32, %c0_i32_0 : i32, i32, i32
  }
  func.func @transform_4(%arg0: i32) -> (i32, i32) {
    %c0_i32 = arith.constant 0 : i32
    %c0_i32_0 = arith.constant 0 : i32
    %c0_i32_1 = arith.constant 0 : i32
    return %c0_i32, %c0_i32_0 : i32, i32
  }
  func.func @transform_5(%arg0: i32) -> (i32, i32) {
    %c0_i32 = arith.constant 0 : i32
    %c0_i32_0 = arith.constant 0 : i32
    %c0_i32_1 = arith.constant 0 : i32
    return %c0_i32, %c0_i32_0 : i32, i32
  }
  func.func @transform_6(%arg0: i32) -> (i32, i32) {
    %c0_i32 = arith.constant 0 : i32
    %c0_i32_0 = arith.constant 0 : i32
    %c0_i32_1 = arith.constant 0 : i32
    return %c0_i32, %c0_i32_0 : i32, i32
  }
  func.func @transform_7(%arg0: i32) -> (i32, i32) {
    %c0_i32 = arith.constant 0 : i32
    %c0_i32_0 = arith.constant 0 : i32
    %c0_i32_1 = arith.constant 0 : i32
    return %c0_i32, %c0_i32_0 : i32, i32
  }
  func.func @transform_8(%arg0: i32) -> (i32, i32) {
    %c0_i32 = arith.constant 0 : i32
    %c0_i32_0 = arith.constant 0 : i32
    %c0_i32_1 = arith.constant 0 : i32
    return %c0_i32, %c0_i32_0 : i32, i32
  }
  func.func @transform_9(%arg0: i32) -> (i32, i32) {
    %c0_i32 = arith.constant 0 : i32
    %c0_i32_0 = arith.constant 0 : i32
    %c0_i32_1 = arith.constant 0 : i32
    return %c0_i32, %c0_i32_0 : i32, i32
  }
  func.func @transform_10(%arg0: i32) -> (i32, i32) {
    %c0_i32 = arith.constant 0 : i32
    %c0_i32_0 = arith.constant 0 : i32
    %c0_i32_1 = arith.constant 0 : i32
    return %c0_i32, %c0_i32_0 : i32, i32
  }
  func.func @transform_11(%arg0: i32) -> (i32, i32) {
    %c0_i32 = arith.constant 0 : i32
    %c0_i32_0 = arith.constant 0 : i32
    %c0_i32_1 = arith.constant 0 : i32
    return %c0_i32, %c0_i32_0 : i32, i32
  }
  func.func @transform_12(%arg0: i32) -> (i32, i32) {
    %c0_i32 = arith.constant 0 : i32
    %c0_i32_0 = arith.constant 0 : i32
    %c0_i32_1 = arith.constant 0 : i32
    return %c0_i32, %c0_i32_0 : i32, i32
  }
  func.func @transform_13(%arg0: i32) -> (i32, i32) {
    %c0_i32 = arith.constant 0 : i32
    %c0_i32_0 = arith.constant 0 : i32
    %c0_i32_1 = arith.constant 0 : i32
    return %c0_i32, %c0_i32_0 : i32, i32
  }
  func.func @transform_14(%arg0: i32) -> (i32, i32) {
    %c0_i32 = arith.constant 0 : i32
    %c0_i32_0 = arith.constant 0 : i32
    %c0_i32_1 = arith.constant 0 : i32
    return %c0_i32, %c0_i32_0 : i32, i32
  }
  func.func @transform_15(%arg0: i32) -> (i32, i32) {
    %c0_i32 = arith.constant 0 : i32
    %c0_i32_0 = arith.constant 0 : i32
    %c0_i32_1 = arith.constant 0 : i32
    return %c0_i32, %c0_i32_0 : i32, i32
  }
  func.func @transform_16(%arg0: i32) -> (i32, i32) {
    %c0_i32 = arith.constant 0 : i32
    %c0_i32_0 = arith.constant 0 : i32
    %c0_i32_1 = arith.constant 0 : i32
    return %c0_i32, %c0_i32_0 : i32, i32
  }
  func.func @transform_17(%arg0: i32) -> (i32, i32) {
    %c0_i32 = arith.constant 0 : i32
    %c0_i32_0 = arith.constant 0 : i32
    %c0_i32_1 = arith.constant 0 : i32
    return %c0_i32, %c0_i32_0 : i32, i32
  }
  func.func @transform_18(%arg0: i32) -> (i32, i32) {
    %c0_i32 = arith.constant 0 : i32
    %c0_i32_0 = arith.constant 0 : i32
    %c0_i32_1 = arith.constant 0 : i32
    return %c0_i32, %c0_i32_0 : i32, i32
  }
  func.func @transform_19(%arg0: i32) -> (i32, i32) {
    %c0_i32 = arith.constant 0 : i32
    %c0_i32_0 = arith.constant 0 : i32
    %c0_i32_1 = arith.constant 0 : i32
    return %c0_i32, %c0_i32_0 : i32, i32
  }
  func.func @transform_20(%arg0: i32) -> (i32, i32) {
    %c0_i32 = arith.constant 0 : i32
    %c0_i32_0 = arith.constant 0 : i32
    %c0_i32_1 = arith.constant 0 : i32
    return %c0_i32, %c0_i32_0 : i32, i32
  }
  func.func @transform_21(%arg0: i32) -> (i32, i32) {
    %c0_i32 = arith.constant 0 : i32
    %c0_i32_0 = arith.constant 0 : i32
    %c0_i32_1 = arith.constant 0 : i32
    return %c0_i32, %c0_i32_0 : i32, i32
  }
  func.func @transform_22(%arg0: i32) -> (i32, i32, i32) {
    %c0_i32 = arith.constant 0 : i32
    %c0_i32_0 = arith.constant 0 : i32
    %c0_i32_1 = arith.constant 0 : i32
    return %arg0, %c0_i32, %c0_i32_0 : i32, i32, i32
  }
}

</mosaic_0001>

<bundles_post_ra>
// kernel: decoder_layer.1
= control target key start
LH: loop header
LB: loop body
LE: loop exit
PB: predicated region body
PF: predicated region fallthrough
CT: control target
= control target key end

     0   :  { %s2947_s0 = inlined_call_operand.vmem [shape: f32[2,8,32], index: 0, kind: input, shape index: {}]   ;;  %s2948_s1 = inlined_call_operand.hbm [shape: f32[2,8,32], index: 1, kind: input, shape index: {}]   ;;  %s2949_s2 = inlined_call_operand.vmem [shape: bf16[2,8,8], index: 2, kind: input, shape index: {}]   ;;  %s2950_s3 = inlined_call_operand.vmem [shape: bf16[2,8,8], index: 3, kind: input, shape index: {}]   ;;  %s2951_s4 = inlined_call_operand.hbm [shape: bf16[32,32], index: 4, kind: input, shape index: {}]   ;;  %s2952_s5 = inlined_call_operand.hbm [shape: bf16[32,32], index: 5, kind: input, shape index: {}]   ;;  %s2953_s6 = inlined_call_operand.hbm [shape: bf16[32,32], index: 6, kind: input, shape index: {}]   ;;  %s2954_s7 = inlined_call_operand.hbm [shape: bf16[32,32], index: 7, kind: input, shape index: {}]   ;;  %s2955_s8 = inlined_call_operand.vmem [shape: f32[1,32], index: 8, kind: input, shape index: {}, may-alias: {8,14,20}]   ;;  %s2956_s9 = inlined_call_operand.vmem [shape: f32[1,32], index: 9, kind: input, shape index: {}, may-alias: {9,15,21}]   ;;  %s2957_s10 = inlined_call_operand.hbm [shape: bf16[32,32], index: 10, kind: input, shape index: {}]   ;;  %s2958_s11 = inlined_call_operand.hbm [shape: bf16[32,32], index: 11, kind: input, shape index: {}]   ;;  %s2959_s12 = inlined_call_operand.hbm [shape: bf16[32,32], index: 12, kind: input, shape index: {}]   ;;  %s2960_s13 = inlined_call_operand.hbm [shape: bf16[32,32], index: 13, kind: input, shape index: {}]   ;;  %s2961_s14 = inlined_call_operand.vmem [shape: f32[1,32], index: 14, kind: input, shape index: {}, may-alias: {8,14,20}]   ;;  %s2962_s15 = inlined_call_operand.vmem [shape: f32[1,32], index: 15, kind: input, shape index: {}, may-alias: {9,15,21}]   ;;  %s2963_s16 = inlined_call_operand.vmem [shape: bf16[32,64], index: 16, kind: input, shape index: {}]   ;;  %s2964_s17 = inlined_call_operand.hbm [shape: f32[1,64], index: 17, kind: input, shape index: {}]   ;;  %s2965_s18 = inlined_call_operand.vmem [shape: bf16[64,32], index: 18, kind: input, shape index: {}]   ;;  %s2966_s19 = inlined_call_operand.hbm [shape: f32[1,32], index: 19, kind: input, shape index: {}]   ;;  %s2967_s20 = inlined_call_operand.vmem [shape: f32[1,32], index: 20, kind: input, shape index: {}, may-alias: {8,14,20}]   ;;  %s2968_s21 = inlined_call_operand.vmem [shape: f32[1,32], index: 21, kind: input, shape index: {}, may-alias: {9,15,21}]   ;;  %s2969_s22 = inlined_call_operand.hbm [shape: f32[2,8,32], index: 22, kind: output, shape index: {}]  }
   0x1   :  { %2972 = sst [smem:[#allocation28_spill]] %s2947_s0 }
   0x2   :  { %2973 = sst [smem:[#allocation29_spill]] %s2948_s1 }
   0x3   :  { %2974 = sst [smem:[#allocation30_spill]] %s2949_s2 }
   0x4   :  { %2975 = sst [smem:[#allocation31_spill]] %s2950_s3 }
   0x5   :  { %2976 = sst [smem:[#allocation32_spill]] %s2951_s4 }
   0x6   :  { %2977 = sst [smem:[#allocation33_spill]] %s2952_s5 }
   0x7   :  { %2978 = sst [smem:[#allocation34_spill]] %s2953_s6 }
   0x8   :  { %2979 = sst [smem:[#allocation35_spill]] %s2954_s7 }
   0x9   :  { %2980 = sst [smem:[#allocation36_spill]] %s2957_s10 }
   0xa   :  { %2981 = sst [smem:[#allocation37_spill]] %s2958_s11 }
   0xb   :  { %2982 = sst [smem:[#allocation38_spill]] %s2959_s12 }
   0xc   :  { %2983 = sst [smem:[#allocation39_spill]] %s2960_s13 }
   0xd   :  { %2984 = sst [smem:[#allocation40_spill]] %s2961_s14 }
   0xe   :  { %2985 = sst [smem:[#allocation41_spill]] %s2962_s15 }
   0xf   :  { %2986 = sst [smem:[#allocation42_spill]] %s2964_s17 }
  0x10   :  { %2987 = sst [smem:[#allocation43_spill]] %s2967_s20 }
  0x11   :  { %2988 = sst [smem:[#allocation44_spill]] %s2968_s21 }
  0x12   :  { %2989 = sst [smem:[#allocation45_spill]] %s2969_s22 }
  0x13   :  { %27 = vsyncpa [#allocation3], 0 }
  0x14   :  { %29 = vsyncpa [#allocation3 + $0x1], 0 }
  0x15   :  { %30 = vsyncpa [#allocation6], 0 }
  0x16   :  { %31 = vsyncpa [#allocation9], 0 }
  0x17   :  { %32 = vsyncpa [#allocation12], 0 }
  0x18   :  { %33 = vsyncpa [#allocation15], 0 }
  0x19   :  { %34 = vsyncpa [#allocation18], 0 }
  0x1a   :  { %35 = vsyncpa [#allocation4], 0 }
  0x1b   :  { %37 = vsyncpa [#allocation4 + $0x1], 0  ;;  %s2606_s3 = smov 0   ;;  %s2608_s28 = smov 0  }
  0x1c   :  { %s2610_s29 = smov 0   ;;  %s2612_s30 = smov 0  }
  0x1d LB: > { %s2990_s23 = sld [smem:[#allocation32_spill]]  ;;  %s2630_s5 = sadd.s32 4294967295, %s2476_s30   ;;  %s2476_s30 = sphi %s2612_s30, %s3019_s30   ;;  %s2472_s29 = sphi %s2610_s29, %s3018_s29   ;;  %s2468_s28 = sphi %s2608_s28, %s3017_s28   ;;  %s2464_s3 = sphi %s2606_s3, %s3016_s3  }
  0x1e   : > { %p1728_p0 = scmp.ge.s32.totalorder %s2476_s30, 1  ;;  %p90_p1 = scmp.eq.s32.totalorder %s2630_s5, 0 }
  0x1f   : > { %p556_p2 = scmp.lt.s32.totalorder %s2476_s30, 3  ;;  %s2478_s6 = smov [#allocation5]  }
  0x20   : > { %s569_s25 = sshll.u32 %s2478_s6, 4  ;;  %s2992_s27 = sld [smem:[#allocation34_spill]]  ;;  %s570_s25 = int_to_ptr.vmem [resolvable:$true] %s569_s25 }
  0x21   : > { %p2635_p3 = pnand %p1728_p0, %p556_p2  ;;  %s2994_s10 = sld [smem:[#allocation36_spill]] }
  0x22   : > { %s2479_s22 = smov [#allocation8]   ;;  %s2480_s15 = smov 64  }
  0x23   : > { %s567_s1 = sshll.u32 %s2990_s23, 4  ;;  %p1930_p4 = pneg %p2635_p3  ;;  %s568_s1 = int_to_ptr.hbm [resolvable:$true] %s567_s1 }
  0x24   : > { %s597_s20 = sshll.u32 %s2479_s22, 4  ;;  %s2481_s14 = smov 4   ;;  %s598_s20 = int_to_ptr.vmem [resolvable:$true] %s597_s20 }
  0x25   : > { %p2647_p6 = pnand %p1930_p4, %p90_p1  ;;  %s2995_s12 = sld [smem:[#allocation38_spill]] }
  0x26   : > { %s595_s4 = sshll.u32 %s2992_s27, 4  ;;  %s2482_s22 = smov [#allocation11]   ;;  %s596_s4 = int_to_ptr.hbm [resolvable:$true] %s595_s4 }
  0x27   : > { %s629_s6 = sshll.u32 %s2994_s10, 4  ;;  %s631_s27 = sshll.u32 %s2482_s22, 4  ;;  %s630_s6 = int_to_ptr.hbm [resolvable:$true] %s629_s6  ;;  %s632_s27 = int_to_ptr.vmem [resolvable:$true] %s631_s27 }
  0x28   : > { %1933 = dma.hbm_to_vmem [thread:$0]  (!%p2647_p6), %s568_s1, 256, %s570_s25, [#allocation6], %s2480_s15, %s2480_s15, %s2481_s14  }
  0x29   : > { %1939 = dma.hbm_to_vmem [thread:$0]  (!%p2647_p6), %s596_s4, 256, %s598_s20, [#allocation9], %s2480_s15, %s2480_s15, %s2481_s14  }
  0x2a   : > { %1945 = dma.hbm_to_vmem [thread:$0]  (!%p2647_p6), %s630_s6, 256, %s632_s27, [#allocation12], %s2480_s15, %s2480_s15, %s2481_s14  }
  0x2b   : > { %s657_s2 = sshll.u32 %s2995_s12, 4  ;;  %s2483_s1 = smov [#allocation14]   ;;  %s658_s2 = int_to_ptr.hbm [resolvable:$true] %s657_s2 }
  0x2c   : > { %s659_s25 = sshll.u32 %s2483_s1, 4  ;;  %s2996_s17 = sld [smem:[#allocation42_spill]]  ;;  %s660_s25 = int_to_ptr.vmem [resolvable:$true] %s659_s25 }
  0x2d   : > { %1951 = dma.hbm_to_vmem [thread:$0]  (!%p2647_p6), %s658_s2, 256, %s660_s25, [#allocation15], %s2480_s15, %s2480_s15, %s2481_s14  }
  0x2e   : > { %s2997_s21 = sld [smem:[#allocation33_spill]]  ;;  %s2484_s12 = smov [#allocation17]  }
  0x2f   : > { %s697_s6 = sshll.u32 %s2484_s12, 4  ;;  %s2485_s10 = smov [#allocation7]   ;;  %s698_s6 = int_to_ptr.vmem [resolvable:$true] %s697_s6 }
  0x30   : > { %s583_s27 = sshll.u32 %s2485_s10, 4  ;;  %s2998_s7 = sld [smem:[#allocation35_spill]]  ;;  %s584_s27 = int_to_ptr.vmem [resolvable:$true] %s583_s27 }
  0x31   : > { %s2999_s11 = sld [smem:[#allocation37_spill]]  ;;  %s2486_s4 = smov [#allocation10]  }
  0x32   : > { %s695_s20 = sshll.u32 %s2996_s17, 4  ;;  %s2487_s26 = smov [#allocation13]   ;;  %s696_s20 = int_to_ptr.hbm [resolvable:$true] %s695_s20 }
  0x33   : > { %1957 = dma.hbm_to_vmem [thread:$0]  (!%p2647_p6), %s696_s20, 16, %s698_s6, [#allocation18]  }
  0x34   : > { %s581_s22 = sshll.u32 %s2997_s21, 4  ;;  %s611_s20 = sshll.u32 %s2486_s4, 4  ;;  %s582_s22 = int_to_ptr.hbm [resolvable:$true] %s581_s22  ;;  %s612_s20 = int_to_ptr.vmem [resolvable:$true] %s611_s20 }
  0x35   : > { %1936 = dma.hbm_to_vmem [thread:$0]  (!%p2647_p6), %s582_s22, 256, %s584_s27, [#allocation6], %s2480_s15, %s2480_s15, %s2481_s14  }
  0x36   : > { %s609_s17 = sshll.u32 %s2998_s7, 4  ;;  %s645_s21 = sshll.u32 %s2487_s26, 4  ;;  %s610_s17 = int_to_ptr.hbm [resolvable:$true] %s609_s17  ;;  %s646_s21 = int_to_ptr.vmem [resolvable:$true] %s645_s21 }
  0x37   : > { %s643_s25 = sshll.u32 %s2999_s11, 4  ;;  %s3000_s13 = sld [smem:[#allocation39_spill]]  ;;  %s644_s25 = int_to_ptr.hbm [resolvable:$true] %s643_s25 }
  0x38   : > { %1942 = dma.hbm_to_vmem [thread:$0]  (!%p2647_p6), %s610_s17, 256, %s612_s20, [#allocation9], %s2480_s15, %s2480_s15, %s2481_s14  }
  0x39   : > { %1948 = dma.hbm_to_vmem [thread:$0]  (!%p2647_p6), %s644_s25, 256, %s646_s21, [#allocation12], %s2480_s15, %s2480_s15, %s2481_s14  }
  0x3a   : > { %s710_s1 = sshll.u32 %s2966_s19, 4  ;;  %s2488_s23 = smov [#allocation16]   ;;  %s711_s1 = int_to_ptr.hbm [resolvable:$true] %s710_s1 }
  0x3b   : > { %s673_s2 = sshll.u32 %s2488_s23, 4  ;;  %s2489_s12 = smov [#allocation19]   ;;  %s674_s2 = int_to_ptr.vmem [resolvable:$true] %s673_s2 }
  0x3c   : > { %s712_s25 = sshll.u32 %s2489_s12, 4  ;;  %s1727_s4 = sadd.s32 4294967294, %s2476_s30   ;;  %s713_s25 = int_to_ptr.vmem [resolvable:$true] %s712_s25 }
  0x3d   : > { %s671_s10 = sshll.u32 %s3000_s13, 4  ;;  %s2721_s20 = sadd.s32 1, %s2476_s30   ;;  %s672_s10 = int_to_ptr.hbm [resolvable:$true] %s671_s10 }
  0x3e   : > { %1954 = dma.hbm_to_vmem [thread:$0]  (!%p2647_p6), %s672_s10, 256, %s674_s2, [#allocation15], %s2480_s15, %s2480_s15, %s2481_s14  }
  0x3f   : > { %1960 = dma.hbm_to_vmem [thread:$0]  (!%p2647_p6), %s711_s1, 16, %s713_s25, [#allocation18]  }
  0x40   : > { %s73_s26 = ssub.s32 %s2476_s30, %s2721_s20  ;;  %s76_s21 = sadd.s32 1, %s2472_s29 }
  0x41   : > { %p74_p7 = scmp.eq.s32.totalorder %s73_s26, 0  ;;  %p83_p8 = scmp.ne.s32.totalorder %s2472_s29, %s2468_s28 }
  0x42   : > { %p84_p9 = scmp.eq.s32.totalorder %s2476_s30, 0  ;;  %p89_p10 = scmp.ne.s32.totalorder %s2468_s28, %s2464_s3 }
  0x43   : > { %s2732_s14 = scalar_select %p74_p7, %s2472_s29, %s76_s21  }
  0x44   : > { %p2734_p11 = por %p84_p9, %p83_p8  ;;  %p2740_p12 = por %p90_p1, %p89_p10 }
  0x45   : > { %p543_p13 = scmp.eq.s32.totalorder %s2630_s5, 1  ;;  %p549_p0 = scmp.eq.s32.totalorder %s1727_s4, 1 }
  0x46   : > { %p1979_p2 = scmp.lt.s32.totalorder %s2476_s30, 2  ;;  %s736_s6 = sand.u32 1, %s2472_s29  }
  0x47   : > { %p2747_p4 = por %p543_p13, %p83_p8  ;;  %p2751_p6 = por %p549_p0, %p89_p10 }
  0x48   : > { %s1740_s27 = sshll.u32 %s736_s6, 3  ;;  %s1741_s17 = sshll.u32 %s2476_s30, 3 }
  0x49   : > { %s3005_s2 = sld [smem:[#allocation29_spill]]  ;;  %s740_s25 = scalar_lea.vmem [#allocation2], %s1740_s27 }
  0x4a   : > { %s748_s26 = sshll.u32 %s740_s25, 4  ;;  %p2761_p7 = pnand %p1979_p2, %p2734_p11  ;;  %s749_s26 = int_to_ptr.vmem [resolvable:$true] %s748_s26 }
  0x4b   : > { %s737_s7 = scalar_lea.sflag [#allocation3], %s736_s6 }
  0x4c   : > { %p2364_p9 = pneg %p2761_p7 }
  0x4f   : > { %s744_s12 = scalar_lea.hbm %s3005_s2, %s1741_s17  ;;  %s2367_s1 = scalar_lea.hbm %s3005_s2, 16 }
  0x50   : > { %s746_s21 = sshll.u32 %s744_s12, 4  ;;  %s747_s21 = int_to_ptr.hbm [resolvable:$true] %s746_s21 }
  0x51   : > { %s2360_s11 = sshra.s32 %s747_s21, 4  ;;  %s2361_s11 = int_to_ptr.hbm [resolvable:$true] %s2360_s11 }
  0x52   : > { %s2362_s13 = scalar_lea.hbm %s2361_s11, 8  ;;  %p2368_p11 = scmp.lt.s32.totalorder %s2361_s11, %s3005_s2 }
  0x53   : > { %p2363_p8 = scmp.ne.s32.totalorder %s2361_s11, %s2362_s13  ;;  %p2369_p0 = scmp.lt.s32.totalorder %s2367_s1, %s2362_s13 }
  0x55   : > { %p2365_p10 = pnand %p2364_p9, %p2363_p8  ;;  %p2370_p2 = por %p2369_p0, %p2368_p11 }
  0x57   : > { %p2366_p13 = pneg %p2365_p10 }
  0x59   : > { %p2371_p5 = pnand %p2370_p2, %p2366_p13 }
  0x5b   : > { %2374 = shalt.err (!%p2371_p5)
}
  0x5c   : > { %1964 = dma.hbm_to_vmem [thread:$0]  (!%p2761_p7), %s747_s21, 128, %s749_s26, %s737_s7  }
  0x5d   : > { %771 = sbr.rel (%p2635_p3) target bundleno = 2782 (0xade), region = 108  ;;  %s2778_s6 = sand.u32 (!%p2635_p3), 1, %s2468_s28  }
  0x5e   : > { %s1743_s12 = sshll.u32 (!%p2635_p3), %s2778_s6, 3  ;;  %s774_s25 = scalar_lea.sflag (!%p2635_p3), [#allocation3], %s2778_s6 }
  0x5f   : > { %s2784_s11 = scalar_lea.vmem (!%p2635_p3), [#allocation2], %s1743_s12 }
  0x62   : > { %2435 = dma.done.wait (%p2740_p12), %s774_s25, 128  }
  0x63   : > { %2437 = vsyncadd (%p2740_p12), %s774_s25, 4294967168 }
  0x64   : > { %2439 = dma.done.wait (%p90_p1), [#allocation6], 512  }
  0x65   : > { %2441 = vsyncadd (%p90_p1), [#allocation6], 4294966784 }
  0x66   : > { %2443 = dma.done.wait (%p90_p1), [#allocation9], 512  }
  0x67   : > { %2445 = vsyncadd (%p90_p1), [#allocation9], 4294966784 }
  0x68   : > { %2447 = dma.done.wait (%p90_p1), [#allocation12], 512  }
  0x69   : > { %2449 = vsyncadd (%p90_p1), [#allocation12], 4294966784 }
  0x6a   : > { %2451 = dma.done.wait (%p90_p1), [#allocation15], 512  }
  0x6b   : > { %2453 = vsyncadd (%p90_p1), [#allocation15], 4294966784 }
  0x6c   : > { %2455 = dma.done.wait (%p90_p1), [#allocation18], 32  }
  0x6d   : > { %2457 = vsyncadd (%p90_p1), [#allocation18], 4294967264  ;;  %p901_p3 = scmp.lt.s32.totalorder %s2630_s5, 1  ;;  %s3007_s26 = sld [smem:[#allocation28_spill]]  ;;  %v1865_v0 = vld [vmem:[#allocation5 + $0x8] sm:$0xff]  ;;  %v1867_v1 = vld [vmem:[#allocation7 + $0x8] sm:$0xff] }
  0x6e   : > { %v1864_v2 = vld [vmem:[#allocation5] sm:$0xff]  ;;  %v1866_v3 = vld [vmem:[#allocation7] sm:$0xff]  ;;  %958 = vmatpush.bf16.msra.mxu0 %v1865_v0  ;;  %983 = vmatpush.bf16.msra.mxu1 %v1867_v1  ;;  %vm948_vm0 = vcmask 261120   ;;  %v1869_v13 = vld [vmem:[#allocation8 + $0x8] sm:$0xff]  ;;  %s3008_s1 = sld [smem:[#allocation30_spill]]  ;;  %vm1040_vm2 = vcmask 64512  }
  0x6f   : > { %s2812_s7 = scalar_select %p901_p3, %s2630_s5, 1  ;;  %1008 = vmatpush.bf16.msra.mxu2 %v1869_v13  ;;  %v1868_v14 = vld [vmem:[#allocation8] sm:$0xff]  ;;  %vm1070_vm3 = vcmask 1043456   ;;  %v1871_v31 = vld [vmem:[#allocation10 + $0x8] sm:$0xff]  ;;  %v1870_v32 = vld [vmem:[#allocation10] sm:$0xff]  ;;  %v2490_v53 = vmov 32.0  }
  0x70   : > { %v1875_v54 = vld [vmem:[#allocation13 + $0x8] sm:$0xff]  ;;  %s3012_s25 = sld [smem:[#allocation43_spill]]  ;;  %s1511_s17 = scalar_lea.sflag [#allocation4], %s2778_s6 }
  0x71   : > { %s1755_s13 = sshll.u32 %s2812_s7, 3  ;;  %s1756_s4 = sshll.u32 %s2812_s7, 2 }
  0x72   : > { %959 = vmatpush.bf16.msra.mxu0 %v1864_v2  ;;  %984 = vmatpush.bf16.msra.mxu1 %v1866_v3  ;;  %v1874_v2 = vld [vmem:[#allocation13] sm:$0xff]  ;;  %s3013_s24 = sld [smem:[#allocation45_spill]] }
  0x73   : > { %s904_s21 = scalar_lea.vmem %s3007_s26, %s1755_s13  ;;  %1009 = vmatpush.bf16.msra.mxu2 %v1868_v14  ;;  %v915_v3 = vld [vmem:[%s2784_s11] sm:$0xff]  ;;  %s3009_s26 = sld [smem:[#allocation31_spill]] }
  0x74   : > { %v2818_v4 = vld [vmem:[%s904_s21] sm:$0xff]  ;;  %s908_s23 = scalar_lea.vmem %s3008_s1, %s1756_s4  ;;  %s1861_s1 = sshll.u32 %s2630_s5, 3 }
  0x75   : > { %v935_v5 = vpack.c.bf16 %v2818_v4, %v2818_v4  ;;  %v916_v15 = vld [vmem:[%s908_s23] sm:$0xf]  ;;  %s3014_s7 = sld [smem:[#allocation44_spill]]  ;;  %s900_s5 = scalar_lea.vmem [#allocation20], %s1743_s12 }
  0x76   : > { %v1037_v16 = vunpack.c.l.bf16 %v916_v15  ;;  %1109 = vmatpush.bf16.msrb.mxu1 %v1871_v31  ;;  %v1876_v31 = vld [vmem:[#allocation14] sm:$0xff] }
  0x77   : > { %1766 = vmatmul.msk.bf16.vlgmr.msra.gmra.mxu0 %vm948_vm0, %v935_v5  ;;  %1775 = vmatmul.msk.bf16.vlgmr.msra.gmra.mxu1 %vm948_vm0, %v935_v5 }
  0x78   : > { %1784 = vmatmul.msk.bf16.vlgmr.msra.gmra.mxu2 %vm948_vm0, %v935_v5  ;;  %vm1038_vm1 = vcmp.ge.f32.partialorder %v1037_v16, 0.5  ;;  %v1873_v5 = vld [vmem:[#allocation11 + $0x8] sm:$0xff]  ;;  %v2036_v16 = vld [vmem:[%s2955_s8] ss:$0 sm:$0xff]  ;;  %s1521_s0 = scalar_lea.hbm %s3013_s24, %s1861_s1  ;;  %s2410_s12 = scalar_lea.hbm %s3013_s24, 16 }
  0x79   : > { %1195 = vmatpush.bf16.msrb.mxu2 %v1873_v5  ;;  %s912_s21 = scalar_lea.vmem %s3009_s26, %s1756_s4  ;;  %s3010_s26 = sld [smem:[#allocation40_spill]] }
  0x7a   : > { %1110 = vmatpush.bf16.msrb.mxu1 %v1870_v32  ;;  %v1153_v32 = vld [vmem:[%s912_s21] sm:$0xf]  ;;  %s3011_s4 = sld [smem:[#allocation41_spill]]  ;;  %s1525_s27 = sshll.u32 %s1521_s0, 4  ;;  %s1526_s27 = int_to_ptr.hbm [resolvable:$true] %s1525_s27 }
  0x7b   : > { %s2404_s23 = sshra.s32 %s1526_s27, 4  ;;  %s2405_s23 = int_to_ptr.hbm [resolvable:$true] %s2404_s23 }
  0x7c   : > { %s2406_s1 = scalar_lea.hbm %s2405_s23, 8  ;;  %p2411_p7 = scmp.lt.s32.totalorder %s2405_s23, %s3013_s24 }
  0x7d   : > { %p2407_p1 = scmp.ne.s32.totalorder %s2405_s23, %s2406_s1  ;;  %p2412_p8 = scmp.lt.s32.totalorder %s2410_s12, %s2406_s1 }
  0x7f   : > { %p2408_p5 = pnand %p2407_p1, %p2747_p4  ;;  %p2413_p9 = por %p2412_p8, %p2411_p7 }
  0x81   : > { %p2409_p12 = pneg %p2408_p5 }
  0x83   : > { %p2414_p10 = pnand %p2413_p9, %p2409_p12 }
  0xf4   : > { %v961_v6 = vpop.f32.mrf.mxu0  ;;  %v986_v7 = vpop.f32.mrf.mxu1 }
  0xf5   : > { %v1016_v8 = vpack.c.bf16 %v986_v7, %v986_v7  ;;  %v1015_v10 = vpack.c.bf16 %v961_v6, %v961_v6  ;;  %v1872_v6 = vld [vmem:[#allocation11] sm:$0xff] }
  0xf6   : > { %1196 = vmatpush.bf16.msrb.mxu2 %v1872_v6 }
  0xf7   : > { %v1021_v9 = vsel %vm948_vm0, %v1016_v8, 0 }
  0xf8   : > { %1030 = vmatpush.bf16.xpose.msra.mxu3 %v1021_v9 }
  0xfb   : > { %v1011_v22 = vpop.f32.mrf.mxu2 }
  0xfc   : > { %v963_v11 = vpop.f32.mrf.mxu0  ;;  %v988_v12 = vpop.f32.mrf.mxu1  ;;  %v1066_v29 = vpack.c.bf16 %v1011_v22, %v1011_v22 }
  0xfe   : > { %v1072_v30 = vsel %vm1070_vm3, %v1066_v29, 0 }
  0xff   : > { %1785 = vmatmul.msk.bf16.vlgmr.msra.gmra.mxu3 %vm948_vm0, %v1015_v10  ;;  %1081 = vmatpush.bf16.msrb.mxu0 %v1072_v30  ;;  %v1877_v30 = vld [vmem:[#allocation14 + $0x8] sm:$0xff] }
 0x100   : > { %1223 = vmatpush.bf16.msrb.mxu3 %v1875_v54 }
 0x103   : > { %v1013_v26 = vpop.f32.mrf.mxu2  ;;  %1248 = vmatpush.bf16.msra.mxu0 %v1877_v30 }
 0x104   : > { %1224 = vmatpush.bf16.msrb.mxu3 %v1874_v2 }
 0x107   : > { %1249 = vmatpush.bf16.msra.mxu0 %v1876_v31 }
 0x182   : > { %v1032_v17 = vpop.f32.mrf.mxu3 }
 0x183   : > { %v1036_v18 = vmul.f32 0.35355338, %v1032_v17 }
 0x185   : > { %v1039_v19 = vsel %vm1038_vm1, -1e+09, %v1036_v18 }
 0x186   : > { %v1041_v20 = vsel %vm1040_vm2, %v1039_v19, -inf }
 0x187   : > { %1042 = vmax.xlane.f32.xlu0 %v1041_v20 }
 0x18a   : > { %v1034_v21 = vpop.f32.mrf.mxu3 }
 0x1fa   : > { %v1043_v23 = vpop.xlane.xlu0 %1042 }
 0x1fb   : > { %v1044_v24 = vsub.f32 %v1039_v19, %v1043_v23  ;;  %v2037_v19 = vld [vmem:[%s2956_s9] ss:$0 sm:$0xff] }
 0x1fd   : > { %v1045_v25 = vmul.f32 1.442695, %v1044_v24 }
 0x1ff   : > { %2044 = vpow2.f32 %v1045_v25 }
 0x205   : > { %v2045_v27 = vpop.eup %2044 }
 0x206   : > { %v1047_v28 = vsel %vm1040_vm2, %v2045_v27, 0.0 }
 0x207   : > { %1048 = vadd.xlane.f32.xlu0 %v1047_v28 }
 0x27a   : > { %v1049_v33 = vpop.xlane.xlu0 %1048 }
 0x27b   : > { %2046 = vrcp.f32 %v1049_v33  ;;  %v1061_v37 = vand.u32 2147483648, %v1049_v33  ;;  %v1059_v39 = vand.u32 2147483647, %v1049_v33  ;;  %vm1055_vm5 = vweird.f32 %v1049_v33 }
 0x27c   : > { %2048 = vrcp.f32 %v2490_v53 }
 0x27d   : > { %v1062_v41 = vor.u32 1.1754944e-38, %v1061_v37  ;;  %vm1060_vm7 = vcmp.eq.f32.partialorder %v1059_v39, 8.507059e+37 }
 0x281   : > { %v2047_v34 = vpop.eup %2046 }
 0x282   : > { %v1051_v35 = vmul.f32 %v2047_v34, %v1049_v33  ;;  %vm1056_vm4 = vweird.f32 %v2047_v34  ;;  %v2049_v55 = vpop.eup %2048  ;;  %v1277_v33 = vunpack.c.l.bf16 %v1153_v32 }
 0x283   : > { %vm1057_vm6 = vmor %vm1055_vm5, %vm1056_vm4  ;;  %v1120_v56 = vmul.f32 32.0, %v2049_v55  ;;  %vm1124_vm8 = vweird.f32 %v2049_v55  ;;  %vm1459_vm5 = vcmask 523264  }
 0x284   : > { %v1052_v36 = vsub.f32 1.0, %v1051_v35  ;;  %vm1278_vm12 = vcmp.ge.f32.partialorder %v1277_v33, 0.5  ;;  %v1882_v33 = vld [vmem:[%s2965_s18] sm:$0xff] }
 0x285   : > { %v1121_v57 = vsub.f32 1.0, %v1120_v56 }
 0x286   : > { %v1053_v38 = vmul.f32 %v2047_v34, %v1052_v36 }
 0x287   : > { %v1122_v58 = vmul.f32 %v2049_v55, %v1121_v57 }
 0x288   : > { %v1054_v40 = vadd.f32 %v2047_v34, %v1053_v38 }
 0x289   : > { %v1123_v59 = vadd.f32 %v2049_v55, %v1122_v58 }
 0x28a   : > { %v1058_v42 = vsel %vm1057_vm6, %v2047_v34, %v1054_v40 }
 0x28b   : > { %v1063_v43 = vsel %vm1060_vm7, %v1062_v41, %v1058_v42  ;;  %v2840_v60 = vsel %vm1124_vm8, %v2049_v55, %v1123_v59 }
 0x28c   : > { %v1064_v44 = vmul.f32 %v2045_v27, %v1063_v43 }
 0x28e   : > { %v1065_v45 = vpack.c.bf16 %v1064_v44, %v1064_v44 }
 0x290   : > { %1786 = vmatmul.msk.bf16.vlgmr.msrb.gmra.mxu0 %vm1040_vm2, %v1065_v45 }
 0x30d   : > { %v1083_v46 = vpop.f32.mrf.mxu0 }
 0x30e   : > { %v1087_v47 = vpack.c.bf16 %v1083_v46, %v1083_v46 }
 0x310   : > { %1795 = vmatmul.msk.bf16.vlgmr.msrb.gmra.mxu1 %vm948_vm0, %v1087_v47 }
 0x315   : > { %v1085_v48 = vpop.f32.mrf.mxu0 }
 0x316   : > { %v1879_v48 = vld [vmem:[#allocation16 + $0x8] sm:$0xff] }
 0x317   : > { %1347 = vmatpush.bf16.msra.mxu3 %v1879_v48 }
 0x38d   : > { %v1112_v49 = vpop.f32.mrf.mxu1 }
 0x38e   : > { %v1113_v50 = vadd.f32 %v1112_v49, %v2818_v4  ;;  %v1173_v4 = vpack.c.bf16 %v915_v3, %v915_v3  ;;  %v1878_v49 = vld [vmem:[#allocation16] sm:$0xff] }
 0x38f   : > { %1348 = vmatpush.bf16.msra.mxu3 %v1878_v49 }
 0x390   : > { %v1116_v51 = vsel %vm948_vm0, %v1113_v50, 0.0  ;;  %1813 = vmatmul.msk.bf16.vlgmr.msrb.gmra.mxu3 %vm948_vm0, %v1173_v4  ;;  %1822 = vmatmul.msk.bf16.vlgmr.msra.gmra.mxu0 %vm948_vm0, %v1173_v4 }
 0x391   : > { %1117 = vadd.xlane.f32.xlu1 %v1116_v51 }
 0x395   : > { %v1114_v52 = vpop.f32.mrf.mxu1 }
 0x404   : > { %v1118_v61 = vpop.xlane.xlu1 %1117 }
 0x405   : > { %v1126_v62 = vmul.f32 %v2840_v60, %v1118_v61 }
 0x407   : > { %v1127_v63 = vsub.f32 %v1113_v50, %v1126_v62 }
 0x409   : > { %v1128_v0 = vmul.f32 %v1127_v63, %v1127_v63 }
 0x40b   : > { %v1129_v1 = vsel %vm948_vm0, %v1128_v0, 0.0 }
 0x40c   : > { %1130 = vadd.xlane.f32.xlu1 %v1129_v1 }
 0x40d   : > { %v1251_v39 = vpop.f32.mrf.mxu0 }
 0x40e   : > { %v1305_v40 = vpack.c.bf16 %v1251_v39, %v1251_v39 }
 0x410   : > { %v1310_v41 = vsel %vm1070_vm3, %v1305_v40, 0  ;;  %v2041_v40 = vld [vmem:[#allocation19] ss:$0 sm:$0xff] }
 0x411   : > { %1319 = vmatpush.bf16.msra.mxu2 %v1310_v41 }
 0x413   : > { %v1226_v23 = vpop.f32.mrf.mxu3 }
 0x414   : > { %v1256_v24 = vpack.c.bf16 %v1226_v23, %v1226_v23 }
 0x415   : > { %v1253_v42 = vpop.f32.mrf.mxu0 }
 0x416   : > { %v1261_v25 = vsel %vm948_vm0, %v1256_v24, 0 }
 0x417   : > { %1270 = vmatpush.bf16.xpose.msra.mxu1 %v1261_v25 }
 0x41b   : > { %v1228_v26 = vpop.f32.mrf.mxu3 }
 0x41c   : > { %v2038_v26 = vld [vmem:[%s3010_s26] ss:$0 sm:$0xff] }
 0x47f   : > { %v1131_v7 = vpop.xlane.xlu1 %1130 }
 0x480   : > { %v1132_v8 = vmul.f32 %v1131_v7, %v2840_v60 }
 0x482   : > { %v1133_v9 = vadd.f32 1e-05, %v1132_v8 }
 0x484   : > { %2050 = vrsqrt.f32 %v1133_v9  ;;  %vm1140_vm10 = vweird.f32 %v1133_v9 }
 0x48a   : > { %v2051_v10 = vpop.eup %2050 }
 0x48b   : > { %v1135_v11 = vmul.f32 %v2051_v10, %v1133_v9  ;;  %vm1141_vm9 = vweird.f32 %v2051_v10 }
 0x48c   : > { %vm1142_vm11 = vmor %vm1140_vm10, %vm1141_vm9 }
 0x48d   : > { %v1136_v12 = vmul.f32 %v2051_v10, %v1135_v11 }
 0x48f   : > { %v1137_v13 = vmul.f32 0.5, %v1136_v12  ;;  %v1881_v12 = vld [vmem:[%s2963_s16 + $0x8] sm:$0xff] }
 0x490   : > { %1414 = vmatpush.bf16.msrb.mxu0 %v1881_v12 }
 0x491   : > { %v1138_v14 = vsub.f32 1.5, %v1137_v13  ;;  %v1880_v13 = vld [vmem:[%s2963_s16] sm:$0xff] }
 0x493   : > { %v1139_v15 = vmul.f32 %v2051_v10, %v1138_v14  ;;  %v1885_v14 = vld [vmem:[%s2965_s18 + $0x18] sm:$0xff] }
 0x494   : > { %1415 = vmatpush.bf16.msrb.mxu0 %v1880_v13  ;;  %1467 = vmatpush.bf16.msrb.mxu1 %v1885_v14 }
 0x495   : > { %v1143_v17 = vsel %vm1142_vm11, %v2051_v10, %v1139_v15 }
 0x496   : > { %v1144_v18 = vmul.f32 %v1143_v17, %v1127_v63  ;;  %v1884_v17 = vld [vmem:[%s2965_s18 + $0x10] sm:$0xff] }
 0x498   : > { %v1148_v20 = vmul.f32 %v2036_v16, %v1144_v18  ;;  %1468 = vmatpush.bf16.msrb.mxu1 %v1884_v17 }
 0x49a   : > { %v2853_v21 = vadd.f32 %v2037_v19, %v1148_v20  ;;  %v1883_v19 = vld [vmem:[%s2965_s18 + $0x8] sm:$0xff] }
 0x49c   : > { %v1172_v22 = vpack.c.bf16 %v2853_v21, %v2853_v21  ;;  %1469 = vmatpush.bf16.msrb.mxu1 %v1883_v19 }
 0x49e   : > { %1804 = vmatmul.msk.bf16.vlgmr.msrb.gmra.mxu2 %vm948_vm0, %v1172_v22 }
 0x4a0   : > { %1470 = vmatpush.bf16.msrb.mxu1 %v1882_v33 }
 0x521   : > { %v1198_v27 = vpop.f32.mrf.mxu2 }
 0x522   : > { %v1255_v28 = vpack.c.bf16 %v1198_v27, %v1198_v27 }
 0x524   : > { %1823 = vmatmul.msk.bf16.vlgmr.msra.gmra.mxu1 %vm948_vm0, %v1255_v28  ;;  %v2039_v28 = vld [vmem:[%s3011_s4] ss:$0 sm:$0xff]  ;;  %s1523_s4 = sshll.u32 %s900_s5, 4  ;;  %s1524_s4 = int_to_ptr.vmem [resolvable:$true] %s1523_s4 }
 0x529   : > { %v1200_v29 = vpop.f32.mrf.mxu2 }
 0x5a1   : > { %v1272_v34 = vpop.f32.mrf.mxu1 }
 0x5a2   : > { %v1276_v35 = vmul.f32 0.35355338, %v1272_v34  ;;  %v2040_v34 = vld [vmem:[#allocation17] ss:$0 sm:$0xff] }
 0x5a4   : > { %v1279_v36 = vsel %vm1278_vm12, -1e+09, %v1276_v35 }
 0x5a5   : > { %v1280_v37 = vsel %vm1040_vm2, %v1279_v36, -inf }
 0x5a6   : > { %1281 = vmax.xlane.f32.xlu2 %v1280_v37 }
 0x5a9   : > { %v1274_v38 = vpop.f32.mrf.mxu1 }
 0x619   : > { %v1282_v43 = vpop.xlane.xlu2 %1281 }
 0x61a   : > { %v1283_v44 = vsub.f32 %v1279_v36, %v1282_v43 }
 0x61c   : > { %v1284_v45 = vmul.f32 1.442695, %v1283_v44 }
 0x61e   : > { %2052 = vpow2.f32 %v1284_v45 }
 0x624   : > { %v2053_v46 = vpop.eup %2052 }
 0x625   : > { %v1286_v47 = vsel %vm1040_vm2, %v2053_v46, 0.0 }
 0x626   : > { %1287 = vadd.xlane.f32.xlu2 %v1286_v47 }
 0x699   : > { %v1288_v50 = vpop.xlane.xlu2 %1287 }
 0x69a   : > { %2054 = vrcp.f32 %v1288_v50  ;;  %v1300_v54 = vand.u32 2147483648, %v1288_v50  ;;  %v1298_v56 = vand.u32 2147483647, %v1288_v50  ;;  %vm1294_vm14 = vweird.f32 %v1288_v50 }
 0x69c   : > { %v1301_v58 = vor.u32 1.1754944e-38, %v1300_v54  ;;  %vm1299_vm1 = vcmp.eq.f32.partialorder %v1298_v56, 8.507059e+37 }
 0x6a0   : > { %v2055_v51 = vpop.eup %2054 }
 0x6a1   : > { %v1290_v52 = vmul.f32 %v2055_v51, %v1288_v50  ;;  %vm1295_vm13 = vweird.f32 %v2055_v51 }
 0x6a2   : > { %vm1296_vm15 = vmor %vm1294_vm14, %vm1295_vm13 }
 0x6a3   : > { %v1291_v53 = vsub.f32 1.0, %v1290_v52 }
 0x6a5   : > { %v1292_v55 = vmul.f32 %v2055_v51, %v1291_v53 }
 0x6a7   : > { %v1293_v57 = vadd.f32 %v2055_v51, %v1292_v55 }
 0x6a9   : > { %v1297_v59 = vsel %vm1296_vm15, %v2055_v51, %v1293_v57 }
 0x6aa   : > { %v1302_v61 = vsel %vm1299_vm1, %v1301_v58, %v1297_v59 }
 0x6ab   : > { %v1303_v62 = vmul.f32 %v2053_v46, %v1302_v61  ;;  %v2042_v61 = vld [vmem:[%s3012_s25] ss:$0 sm:$0xff] }
 0x6ad   : > { %v1304_v63 = vpack.c.bf16 %v1303_v62, %v1303_v62 }
 0x6af   : > { %1824 = vmatmul.msk.bf16.vlgmr.msra.gmra.mxu2 %vm1040_vm2, %v1304_v63  ;;  %v2043_v63 = vld [vmem:[%s3014_s7] ss:$0 sm:$0xff] }
 0x732   : > { %v1321_v0 = vpop.f32.mrf.mxu2 }
 0x733   : > { %v1325_v1 = vpack.c.bf16 %v1321_v0, %v1321_v0 }
 0x735   : > { %1833 = vmatmul.msk.bf16.vlgmr.msra.gmra.mxu3 %vm948_vm0, %v1325_v1 }
 0x73a   : > { %v1323_v2 = vpop.f32.mrf.mxu2 }
 0x7b8   : > { %v1350_v3 = vpop.f32.mrf.mxu3 }
 0x7b9   : > { %v1351_v4 = vadd.f32 %v1350_v3, %v2853_v21 }
 0x7bb   : > { %v1354_v5 = vsel %vm948_vm0, %v1351_v4, 0.0 }
 0x7bc   : > { %1355 = vadd.xlane.f32.xlu0 %v1354_v5 }
 0x7c0   : > { %v1352_v6 = vpop.f32.mrf.mxu3 }
 0x82f   : > { %v1356_v7 = vpop.xlane.xlu0 %1355 }
 0x830   : > { %v1357_v8 = vmul.f32 %v1356_v7, %v2840_v60 }
 0x832   : > { %v1358_v9 = vsub.f32 %v1351_v4, %v1357_v8 }
 0x834   : > { %v1359_v10 = vmul.f32 %v1358_v9, %v1358_v9 }
 0x836   : > { %v1360_v11 = vsel %vm948_vm0, %v1359_v10, 0.0 }
 0x837   : > { %1361 = vadd.xlane.f32.xlu1 %v1360_v11 }
 0x8aa   : > { %v1362_v15 = vpop.xlane.xlu1 %1361 }
 0x8ab   : > { %v1363_v16 = vmul.f32 %v1362_v15, %v2840_v60 }
 0x8ad   : > { %v1364_v18 = vadd.f32 1e-05, %v1363_v16 }
 0x8af   : > { %2056 = vrsqrt.f32 %v1364_v18  ;;  %vm1371_vm3 = vweird.f32 %v1364_v18 }
 0x8b5   : > { %v2057_v20 = vpop.eup %2056 }
 0x8b6   : > { %v1366_v21 = vmul.f32 %v2057_v20, %v1364_v18  ;;  %vm1372_vm2 = vweird.f32 %v2057_v20 }
 0x8b7   : > { %vm1373_vm4 = vmor %vm1371_vm3, %vm1372_vm2 }
 0x8b8   : > { %v1367_v22 = vmul.f32 %v2057_v20, %v1366_v21 }
 0x8ba   : > { %v1368_v23 = vmul.f32 0.5, %v1367_v22 }
 0x8bc   : > { %v1369_v24 = vsub.f32 1.5, %v1368_v23 }
 0x8be   : > { %v1370_v25 = vmul.f32 %v2057_v20, %v1369_v24 }
 0x8c0   : > { %v1374_v27 = vsel %vm1373_vm4, %v2057_v20, %v1370_v25 }
 0x8c1   : > { %v1375_v29 = vmul.f32 %v1374_v27, %v1358_v9 }
 0x8c3   : > { %v1379_v30 = vmul.f32 %v2038_v26, %v1375_v29 }
 0x8c5   : > { %v1383_v31 = vadd.f32 %v2039_v28, %v1379_v30 }
 0x8c7   : > { %v1384_v32 = vpack.c.bf16 %v1383_v31, %v1383_v31 }
 0x8c9   : > { %1842 = vmatmul.msk.bf16.vlgmr.msrb.gmra.mxu0 %vm948_vm0, %v1384_v32 }
 0x946   : > { %v1417_v35 = vpop.f32.mrf.mxu0 }
 0x947   : > { %v1418_v36 = vadd.f32 %v2040_v34, %v1417_v35 }
 0x949   : > { %v1421_v37 = vmax.f32 %v1418_v36, 0.0 }
 0x94b   : > { %v1422_v38 = vpack.c.bf16 %v1421_v37, %v1421_v37 }
 0x94d   : > { %1859 = vmatmul.msk.bf16.vlgmr.msrb.gmra.mxu1 %vm1459_vm5, %v1422_v38 }
 0x94e   : > { %v1419_v39 = vpop.f32.mrf.mxu0 }
 0x9ca   : > { %v1472_v41 = vpop.f32.mrf.mxu1 }
 0x9cb   : > { %v1473_v42 = vadd.f32 %v2041_v40, %v1472_v41 }
 0x9cd   : > { %v1476_v43 = vadd.f32 %v1473_v42, %v1383_v31 }
 0x9cf   : > { %v1479_v44 = vsel %vm948_vm0, %v1476_v43, 0.0 }
 0x9d0   : > { %1480 = vadd.xlane.f32.xlu2 %v1479_v44 }
 0x9d2   : > { %v1474_v45 = vpop.f32.mrf.mxu1 }
 0xa43   : > { %v1481_v46 = vpop.xlane.xlu2 %1480 }
 0xa44   : > { %v1482_v47 = vmul.f32 %v1481_v46, %v2840_v60 }
 0xa46   : > { %v1483_v48 = vsub.f32 %v1476_v43, %v1482_v47 }
 0xa48   : > { %v1484_v49 = vmul.f32 %v1483_v48, %v1483_v48 }
 0xa4a   : > { %v1485_v50 = vsel %vm948_vm0, %v1484_v49, 0.0 }
 0xa4b   : > { %1486 = vadd.xlane.f32.xlu0 %v1485_v50 }
 0xabe   : > { %v1487_v51 = vpop.xlane.xlu0 %1486 }
 0xabf   : > { %v1488_v52 = vmul.f32 %v1487_v51, %v2840_v60 }
 0xac1   : > { %v1489_v53 = vadd.f32 1e-05, %v1488_v52 }
 0xac3   : > { %2058 = vrsqrt.f32 %v1489_v53  ;;  %vm1496_vm7 = vweird.f32 %v1489_v53 }
 0xac9   : > { %v2059_v54 = vpop.eup %2058 }
 0xaca   : > { %v1491_v55 = vmul.f32 %v2059_v54, %v1489_v53  ;;  %vm1497_vm6 = vweird.f32 %v2059_v54 }
 0xacb   : > { %vm1498_vm8 = vmor %vm1496_vm7, %vm1497_vm6 }
 0xacc   : > { %v1492_v56 = vmul.f32 %v2059_v54, %v1491_v55 }
 0xace   : > { %v1493_v57 = vmul.f32 0.5, %v1492_v56 }
 0xad0   : > { %v1494_v58 = vsub.f32 1.5, %v1493_v57 }
 0xad2   : > { %v1495_v59 = vmul.f32 %v2059_v54, %v1494_v58 }
 0xad4   : > { %v1499_v60 = vsel %vm1498_vm8, %v2059_v54, %v1495_v59 }
 0xad5   : > { %v1500_v62 = vmul.f32 %v1499_v60, %v1483_v48 }
 0xad7   : > { %v1504_v0 = vmul.f32 %v2042_v61, %v1500_v62 }
 0xad9   : > { %v1508_v1 = vadd.f32 %v2043_v63, %v1504_v0 }
 0xadb   : > { %1509 = vst.msk [vmem:[%s900_s5] sm:$0xff] %vm948_vm0, %v1508_v1 }
 0xadc   : > { %2417 = shalt.err (!%p2414_p10)
}
 0xadd   : > { %1928 = dma.vmem_to_hbm [thread:$0]  (%p2747_p4), %s1524_s4, 128, %s1526_s27, %s1511_s17  }
 0xade PF: > { %s1537_s6 = sand.u32 1, %s2464_s3   ;;  %p3015_p13 = scmp.ge.s32.totalorder %s2476_s30, 2 }
 0xadf   : > { %s1538_s0 = scalar_lea.sflag [#allocation4], %s1537_s6 }
 0xae0   : > { %p1966_p11 = pnand %p3015_p13, %p2751_p6 }
 0xae2   : > { %p1967_p0 = pneg %p1966_p11 }
 0xae4   : > { %2459 = dma.done.wait (%p1967_p0), %s1538_s0, 128  }
 0xae5   : > { %2461 = vsyncadd (%p1967_p0), %s1538_s0, 4294967168  ;;  %p40_p2 = scmp.ge.s32.totalorder %s2721_s20, 4   ;;  %s3016_s3 = smov %s2468_s28 }
 0xae6   : > { %s3017_s28 = smov %s2472_s29  ;;  %s3018_s29 = smov %s2732_s14 }
 0xae7   : > { %s3019_s30 = smov %s2721_s20  ;;  %42 = sbr.rel (!%p40_p2) target bundleno = 29 (0x1d), region = 202 }
 0xaec   :  { %1544 = vsyncpa [#allocation3], 1 }
 0xaed   :  { %1546 = vsyncpa [#allocation3 + $0x1], 1 }
 0xaee   :  { %1547 = vsyncpa [#allocation6], 1 }
 0xaef   :  { %1548 = vsyncpa [#allocation9], 1 }
 0xaf0   :  { %1549 = vsyncpa [#allocation12], 1 }
 0xaf1   :  { %1550 = vsyncpa [#allocation15], 1 }
 0xaf2   :  { %1551 = vsyncpa [#allocation18], 1 }
 0xaf3   :  { %1552 = vsyncpa [#allocation4], 1 }
 0xaf4   :  { %1554 = vsyncpa [#allocation4 + $0x1], 1 }

</bundles_post_ra>
